<compile_context>
chip_gen: v5e
topology: v5e:2x2
jax: 0.10.0
libtpu: 0.0.40
codegen_flags: <defaults>
</compile_context>

<pallas_src>
import jax
import jax.numpy as jnp
from jax import lax
from jax.experimental import pallas as pl
from jax.experimental.pallas import tpu as pltpu


def _round_up(x, m):
    return ((x + m - 1) // m) * m


def sac1_kernel(pk_ref, qr_ref, kb_ref,
                w_pk_ref, b_pk_ref,
                w_qr_ref, b_qr_ref,
                w_kb_ref, b_kb_ref,
                w_main_ref, b_main_ref,
                w_out_ref, b_out_ref,
                out_ref):
    # First-layer compute dtype = dtype of the big (256,64) weights (f32 or bf16).
    cdt = w_pk_ref.dtype

    # In-kernel cast of the activation tiles to the matmul dtype (VPU, free slack);
    # supports f32 / bf16 / int8 producers with no extra wrapper-side HBM pass.
    pk_x = pk_ref[...].astype(cdt)
    qr_x = qr_ref[...].astype(cdt)
    kb_x = kb_ref[...].astype(cdt)

    # Three sub-network Linear(256,64) + ReLU on the MXU, f32 accumulation.
    pk = jnp.maximum(
        jnp.dot(pk_x, w_pk_ref[...], preferred_element_type=jnp.float32)
        + b_pk_ref[...], 0.0)
    qr = jnp.maximum(
        jnp.dot(qr_x, w_qr_ref[...], preferred_element_type=jnp.float32)
        + b_qr_ref[...], 0.0)
    kb = jnp.maximum(
        jnp.dot(kb_x, w_kb_ref[...], preferred_element_type=jnp.float32)
        + b_kb_ref[...], 0.0)

    added = pk + qr + kb  # [tile_b, 64] f32

    # Tail matmuls kept entirely in f32: tiny, MXU has slack, no double-rounding.
    h = jnp.maximum(
        jnp.dot(added, w_main_ref[...], preferred_element_type=jnp.float32)
        + b_main_ref[...], 0.0)  # [tile_b, 32] f32

    # Final Linear(32,1), computed transposed so the output is lane-dense:
    #   [1,32] . [tile_b,32]^T -> [1,tile_b]   (contiguous lane-major store)
    logits = lax.dot_general(
        w_out_ref[...], h,
        dimension_numbers=(((1,), (1,)), ((), ())),
        preferred_element_type=jnp.float32) + b_out_ref[...]  # [1, tile_b]

    out_ref[...] = logits[None, :, :].astype(out_ref.dtype)   # (1, 1, tile_b) block


def prepare_params(params, compute_dtype=jnp.float32):
    """One-time conversion from PyTorch-convention params ([out,in] weights, [out]
    biases) to kernel-ready layout.  Only the three 256->64 weights take
    `compute_dtype` (that is where the HBM/MXU win is); the small tail weights and
    all biases stay f32 to avoid bf16 double-rounding."""
    f32 = jnp.float32
    return dict(
        w_pk=jnp.asarray(params["w_pk"]).T.astype(compute_dtype),     # [256, 64]
        w_qr=jnp.asarray(params["w_qr"]).T.astype(compute_dtype),     # [256, 64]
        w_kb=jnp.asarray(params["w_kb"]).T.astype(compute_dtype),     # [256, 64]
        w_main=jnp.asarray(params["w_main"], f32).T,                  # [64, 32] f32
        w_out=jnp.asarray(params["w_out"], f32),                      # [1, 32]  f32
        b_pk=jnp.asarray(params["b_pk"], f32)[None, :],               # [1, 64]
        b_qr=jnp.asarray(params["b_qr"], f32)[None, :],               # [1, 64]
        b_kb=jnp.asarray(params["b_kb"], f32)[None, :],               # [1, 64]
        b_main=jnp.asarray(params["b_main"], f32)[None, :],           # [1, 32]
        b_out=jnp.asarray(params["b_out"], f32)[None, :],             # [1, 1]
    )


def sac1_forward(pawn_king, queen_rook, knight_bishop, kparams, *, tile_b=2048):
    """kparams: output of prepare_params().  Activations are streamed in whatever
    dtype the caller stores them (f32 / bf16 / int8) -- no wrapper-side cast or pad.

    tile_b guidance: 2048 (default) fits all generations with the limit below;
    up to ~4096 f32 / ~8192 bf16 is safe on v7x's 64 MiB physical VMEM."""
    B, D = pawn_king.shape
    assert queen_rook.shape == (B, D) and knight_bishop.shape == (B, D)

    # Tile selection: sublane-aligned, never larger than requested, and split into
    # >=2 grid steps whenever B allows it so the v7x megacore gets both cores.
    tile_b = max(8, min(tile_b, _round_up(pl.cdiv(B, 2), 8)))
    num_tiles = pl.cdiv(B, tile_b)   # ragged last block handled by Pallas masking

    acts = (pawn_king, queen_rook, knight_bishop)
    act_specs = [pl.BlockSpec((tile_b, D), lambda i: (i, 0)) for _ in acts]

    def const_spec(shape):
        # Weights/biases: same block every grid step -> stay resident in VMEM.
        return pl.BlockSpec(shape, lambda i, _n=len(shape): (0,) * _n)

    consts = (kparams["w_pk"], kparams["b_pk"],
              kparams["w_qr"], kparams["b_qr"],
              kparams["w_kb"], kparams["b_kb"],
              kparams["w_main"], kparams["b_main"],
              kparams["w_out"], kparams["b_out"])

    # Pipeline VMEM footprint (double-buffered activation streams dominate).
    act_bytes = sum(2 * tile_b * D * jnp.dtype(a.dtype).itemsize for a in acts)
    const_bytes = sum(int(c.size) * jnp.dtype(c.dtype).itemsize for c in consts)
    out_bytes = 2 * tile_b * 4
    vmem_need = act_bytes + 2 * const_bytes + out_bytes
    # Raise the scoped-VMEM limit past v5e's 16 MiB default; cap at v7x's 64 MiB
    # physical per-TensorCore VMEM.
    vmem_limit = min(max(int(vmem_need * 1.4), 32 * 1024 * 1024), 64 * 1024 * 1024)

    in_bytes = sum(B * D * jnp.dtype(a.dtype).itemsize for a in acts)
    cost = pl.CostEstimate(
        flops=2 * B * (3 * D * 64 + 64 * 32 + 32),
        transcendentals=0,
        bytes_accessed=in_bytes + B * 4 + const_bytes,
    )

    out = pl.pallas_call(
        sac1_kernel,
        grid=(num_tiles,),
        # 3-D output so the block's last two dims (1, tile_b) match the array dims
        # exactly; the leading grid dim carries the tile index.  Lane-dense store.
        out_shape=jax.ShapeDtypeStruct((num_tiles, 1, tile_b), jnp.float32),
        in_specs=act_specs + [const_spec(c.shape) for c in consts],
        out_specs=pl.BlockSpec((1, 1, tile_b), lambda i: (i, 0, 0)),
        compiler_params=pltpu.CompilerParams(
            dimension_semantics=("parallel",),
            vmem_limit_bytes=vmem_limit),
        cost_estimate=cost,
    )(pawn_king, queen_rook, knight_bishop, *consts)

    # (num_tiles, 1, tile_b) lane-dense slab -> (B, 1) column; the slice drops the
    # ragged-block rows (which may contain garbage -- they are never computed from
    # or mixed with valid rows).
    return out.reshape(num_tiles * tile_b, 1)[:B]


def init_params(key):
    """Deterministic init mimicking nn.Linear default (uniform +-1/sqrt(fan_in)),
    PyTorch convention: weights [out, in], biases [out]."""
    def linear(key, fan_in, fan_out):
        kw, kb = jax.random.split(key)
        bound = 1.0 / jnp.sqrt(fan_in)
        w = jax.random.uniform(kw, (fan_out, fan_in), jnp.float32, -bound, bound)
        b = jax.random.uniform(kb, (fan_out,), jnp.float32, -bound, bound)
        return w, b

    keys = jax.random.split(key, 5)
    w_pk, b_pk = linear(keys[0], 4 * 64, 64)
    w_qr, b_qr = linear(keys[1], 4 * 64, 64)
    w_kb, b_kb = linear(keys[2], 4 * 64, 64)
    w_main, b_main = linear(keys[3], 64, 32)
    w_out, b_out = linear(keys[4], 32, 1)
    return dict(w_pk=w_pk, b_pk=b_pk, w_qr=w_qr, b_qr=b_qr,
                w_kb=w_kb, b_kb=b_kb, w_main=w_main, b_main=b_main,
                w_out=w_out, b_out=b_out)


def sac1_reference(pawn_king, queen_rook, knight_bishop, params):
    """Pure-JAX reference matching the PyTorch forward (PyTorch-convention params)."""
    pk = jax.nn.relu(pawn_king @ params["w_pk"].T + params["b_pk"])
    qr = jax.nn.relu(queen_rook @ params["w_qr"].T + params["b_qr"])
    kb = jax.nn.relu(knight_bishop @ params["w_kb"].T + params["b_kb"])
    added = pk + qr + kb
    h = jax.nn.relu(added @ params["w_main"].T + params["b_main"])
    return h @ params["w_out"].T + params["b_out"]


if __name__ == "__main__":
    key = jax.random.PRNGKey(0)
    k_params, k_pk, k_qr, k_kb = jax.random.split(key, 4)

    params = init_params(k_params)
    kparams_f32 = prepare_params(params, jnp.float32)

    # --- f32 path, B deliberately NOT a tile multiple (exercises the ragged last
    #     block that replaced the wrapper-side jnp.pad) ---
    B = 300
    pawn_king = jax.random.uniform(k_pk, (B, 4 * 64), jnp.float32)
    queen_rook = jax.random.uniform(k_qr, (B, 4 * 64), jnp.float32)
    knight_bishop = jax.random.uniform(k_kb, (B, 4 * 64), jnp.float32)

    ref = sac1_reference(pawn_king, queen_rook, knight_bishop, params)

    out = jax.block_until_ready(
        sac1_forward(pawn_king, queen_rook, knight_bishop, kparams_f32))
    assert out.shape == (B, 1)
    assert jnp.allclose(out, ref, atol=1e-4, rtol=1e-4), "f32 mismatch vs reference"

    # --- bf16 first-layer weights, f32 activations (cast happens inside the kernel,
    #     no extra wrapper-side HBM pass; tail matmuls stay f32) ---
    kparams_bf16 = prepare_params(params, jnp.bfloat16)
    out_bf16 = jax.block_until_ready(
        sac1_forward(pawn_king, queen_rook, knight_bishop, kparams_bf16))
    assert out_bf16.shape == (B, 1)
    assert jnp.allclose(out_bf16, ref, atol=5e-2, rtol=5e-2), "bf16 mismatch vs reference"

    # --- int8 0/1 piece-plane inputs (producer-side narrow dtype: 4x fewer HBM bytes
    #     on the dominant streams; kernel upcasts on the VPU before the MXU dots) ---
    B8 = 64
    kp8 = (jax.random.uniform(jax.random.fold_in(key, 1), (B8, 256)) < 0.1).astype(jnp.int8)
    qr8 = (jax.random.uniform(jax.random.fold_in(key, 2), (B8, 256)) < 0.1).astype(jnp.int8)
    kb8 = (jax.random.uniform(jax.random.fold_in(key, 3), (B8, 256)) < 0.1).astype(jnp.int8)
    ref8 = sac1_reference(kp8.astype(jnp.float32), qr8.astype(jnp.float32),
                          kb8.astype(jnp.float32), params)
    out8 = jax.block_until_ready(sac1_forward(kp8, qr8, kb8, kparams_f32))
    assert out8.shape == (B8, 1)
    assert jnp.allclose(out8, ref8, atol=1e-4, rtol=1e-4), "int8 mismatch vs reference"

    print("KERNEL_OK")
</pallas_src>

<mosaic_0001>
module attributes {stable_mosaic.version = 11 : i64} {
  func.func @sac1_kernel(%arg0: i32, %arg1: memref<152x256xf32, #tpu.memory_space<vmem>>, %arg2: memref<152x256xf32, #tpu.memory_space<vmem>>, %arg3: memref<152x256xf32, #tpu.memory_space<vmem>>, %arg4: memref<256x64xf32, #tpu.memory_space<vmem>>, %arg5: memref<1x64xf32, #tpu.memory_space<vmem>>, %arg6: memref<256x64xf32, #tpu.memory_space<vmem>>, %arg7: memref<1x64xf32, #tpu.memory_space<vmem>>, %arg8: memref<256x64xf32, #tpu.memory_space<vmem>>, %arg9: memref<1x64xf32, #tpu.memory_space<vmem>>, %arg10: memref<64x32xf32, #tpu.memory_space<vmem>>, %arg11: memref<1x32xf32, #tpu.memory_space<vmem>>, %arg12: memref<1x32xf32, #tpu.memory_space<vmem>>, %arg13: memref<1x1xf32, #tpu.memory_space<vmem>>, %arg14: memref<1x1x152xf32, #tpu.memory_space<vmem>>) attributes {dimension_semantics = [#tpu.dimension_semantics<parallel>], iteration_bounds = array<i64: 2>, scalar_prefetch = 0 : i64, scratch_operands = 0 : i64, tpu.core_type = #tpu.core_type<tc>, window_params = [{transform_indices = @transform_0, window_bounds = array<i64: 152, 256>}, {transform_indices = @transform_1, window_bounds = array<i64: 152, 256>}, {transform_indices = @transform_2, window_bounds = array<i64: 152, 256>}, {pipeline_mode = #tpu.pipeline_mode<synchronous>, transform_indices = @transform_3, window_bounds = array<i64: 256, 64>}, {pipeline_mode = #tpu.pipeline_mode<synchronous>, transform_indices = @transform_4, window_bounds = array<i64: 1, 64>}, {pipeline_mode = #tpu.pipeline_mode<synchronous>, transform_indices = @transform_5, window_bounds = array<i64: 256, 64>}, {pipeline_mode = #tpu.pipeline_mode<synchronous>, transform_indices = @transform_6, window_bounds = array<i64: 1, 64>}, {pipeline_mode = #tpu.pipeline_mode<synchronous>, transform_indices = @transform_7, window_bounds = array<i64: 256, 64>}, {pipeline_mode = #tpu.pipeline_mode<synchronous>, transform_indices = @transform_8, window_bounds = array<i64: 1, 64>}, {pipeline_mode = #tpu.pipeline_mode<synchronous>, transform_indices = @transform_9, window_bounds = array<i64: 64, 32>}, {pipeline_mode = #tpu.pipeline_mode<synchronous>, transform_indices = @transform_10, window_bounds = array<i64: 1, 32>}, {pipeline_mode = #tpu.pipeline_mode<synchronous>, transform_indices = @transform_11, window_bounds = array<i64: 1, 32>}, {pipeline_mode = #tpu.pipeline_mode<synchronous>, transform_indices = @transform_12, window_bounds = array<i64: 1, 1>}, {transform_indices = @transform_13, window_bounds = array<i64: 1, 1, 152>}]} {
    %c0 = arith.constant 0 : index
    %c0_0 = arith.constant 0 : index
    %0 = vector.load %arg1[%c0, %c0_0] : memref<152x256xf32, #tpu.memory_space<vmem>>, vector<152x256xf32>
    %c0_1 = arith.constant 0 : index
    %c0_2 = arith.constant 0 : index
    %1 = vector.load %arg2[%c0_1, %c0_2] : memref<152x256xf32, #tpu.memory_space<vmem>>, vector<152x256xf32>
    %c0_3 = arith.constant 0 : index
    %c0_4 = arith.constant 0 : index
    %2 = vector.load %arg3[%c0_3, %c0_4] : memref<152x256xf32, #tpu.memory_space<vmem>>, vector<152x256xf32>
    %c0_5 = arith.constant 0 : index
    %c0_6 = arith.constant 0 : index
    %3 = vector.load %arg4[%c0_5, %c0_6] : memref<256x64xf32, #tpu.memory_space<vmem>>, vector<256x64xf32>
    %cst = arith.constant dense<0.000000e+00> : vector<152x64xf32>
    %4 = tpu.matmul %0, %3, %cst {dimension_numbers = #tpu.dot_dimension_numbers<[1], [0], [0], [1], [0, 0, 1, 1], [], []>} : vector<152x256xf32>, vector<256x64xf32>, vector<152x64xf32> -> vector<152x64xf32>
    %c0_7 = arith.constant 0 : index
    %c0_8 = arith.constant 0 : index
    %5 = vector.load %arg5[%c0_7, %c0_8] : memref<1x64xf32, #tpu.memory_space<vmem>>, vector<1x64xf32>
    %6 = vector.broadcast %5 : vector<1x64xf32> to vector<152x64xf32>
    %7 = arith.addf %4, %6 : vector<152x64xf32>
    %cst_9 = arith.constant 0.000000e+00 : f32
    %8 = vector.broadcast %cst_9 : f32 to vector<152x64xf32>
    %9 = arith.maximumf %7, %8 : vector<152x64xf32>
    %c0_10 = arith.constant 0 : index
    %c0_11 = arith.constant 0 : index
    %10 = vector.load %arg6[%c0_10, %c0_11] : memref<256x64xf32, #tpu.memory_space<vmem>>, vector<256x64xf32>
    %cst_12 = arith.constant dense<0.000000e+00> : vector<152x64xf32>
    %11 = tpu.matmul %1, %10, %cst_12 {dimension_numbers = #tpu.dot_dimension_numbers<[1], [0], [0], [1], [0, 0, 1, 1], [], []>} : vector<152x256xf32>, vector<256x64xf32>, vector<152x64xf32> -> vector<152x64xf32>
    %c0_13 = arith.constant 0 : index
    %c0_14 = arith.constant 0 : index
    %12 = vector.load %arg7[%c0_13, %c0_14] : memref<1x64xf32, #tpu.memory_space<vmem>>, vector<1x64xf32>
    %13 = vector.broadcast %12 : vector<1x64xf32> to vector<152x64xf32>
    %14 = arith.addf %11, %13 : vector<152x64xf32>
    %cst_15 = arith.constant 0.000000e+00 : f32
    %15 = vector.broadcast %cst_15 : f32 to vector<152x64xf32>
    %16 = arith.maximumf %14, %15 : vector<152x64xf32>
    %c0_16 = arith.constant 0 : index
    %c0_17 = arith.constant 0 : index
    %17 = vector.load %arg8[%c0_16, %c0_17] : memref<256x64xf32, #tpu.memory_space<vmem>>, vector<256x64xf32>
    %cst_18 = arith.constant dense<0.000000e+00> : vector<152x64xf32>
    %18 = tpu.matmul %2, %17, %cst_18 {dimension_numbers = #tpu.dot_dimension_numbers<[1], [0], [0], [1], [0, 0, 1, 1], [], []>} : vector<152x256xf32>, vector<256x64xf32>, vector<152x64xf32> -> vector<152x64xf32>
    %c0_19 = arith.constant 0 : index
    %c0_20 = arith.constant 0 : index
    %19 = vector.load %arg9[%c0_19, %c0_20] : memref<1x64xf32, #tpu.memory_space<vmem>>, vector<1x64xf32>
    %20 = vector.broadcast %19 : vector<1x64xf32> to vector<152x64xf32>
    %21 = arith.addf %18, %20 : vector<152x64xf32>
    %cst_21 = arith.constant 0.000000e+00 : f32
    %22 = vector.broadcast %cst_21 : f32 to vector<152x64xf32>
    %23 = arith.maximumf %21, %22 : vector<152x64xf32>
    %24 = arith.addf %9, %16 : vector<152x64xf32>
    %25 = arith.addf %24, %23 : vector<152x64xf32>
    %c0_22 = arith.constant 0 : index
    %c0_23 = arith.constant 0 : index
    %26 = vector.load %arg10[%c0_22, %c0_23] : memref<64x32xf32, #tpu.memory_space<vmem>>, vector<64x32xf32>
    %cst_24 = arith.constant dense<0.000000e+00> : vector<152x32xf32>
    %27 = tpu.matmul %25, %26, %cst_24 {dimension_numbers = #tpu.dot_dimension_numbers<[1], [0], [0], [1], [0, 0, 1, 1], [], []>} : vector<152x64xf32>, vector<64x32xf32>, vector<152x32xf32> -> vector<152x32xf32>
    %c0_25 = arith.constant 0 : index
    %c0_26 = arith.constant 0 : index
    %28 = vector.load %arg11[%c0_25, %c0_26] : memref<1x32xf32, #tpu.memory_space<vmem>>, vector<1x32xf32>
    %29 = vector.broadcast %28 : vector<1x32xf32> to vector<152x32xf32>
    %30 = arith.addf %27, %29 : vector<152x32xf32>
    %cst_27 = arith.constant 0.000000e+00 : f32
    %31 = vector.broadcast %cst_27 : f32 to vector<152x32xf32>
    %32 = arith.maximumf %30, %31 : vector<152x32xf32>
    %c0_28 = arith.constant 0 : index
    %c0_29 = arith.constant 0 : index
    %33 = vector.load %arg12[%c0_28, %c0_29] : memref<1x32xf32, #tpu.memory_space<vmem>>, vector<1x32xf32>
    %cst_30 = arith.constant dense<0.000000e+00> : vector<1x152xf32>
    %34 = tpu.matmul %33, %32, %cst_30 {dimension_numbers = #tpu.dot_dimension_numbers<[1], [1], [0], [0], [0, 0, 1, 0], [], []>} : vector<1x32xf32>, vector<152x32xf32>, vector<1x152xf32> -> vector<1x152xf32>
    %c0_31 = arith.constant 0 : index
    %c0_32 = arith.constant 0 : index
    %35 = vector.load %arg13[%c0_31, %c0_32] : memref<1x1xf32, #tpu.memory_space<vmem>>, vector<1x1xf32>
    %36 = vector.broadcast %35 : vector<1x1xf32> to vector<1x152xf32>
    %37 = arith.addf %34, %36 : vector<1x152xf32>
    %38 = vector.shape_cast %37 : vector<1x152xf32> to vector<1x1x152xf32>
    %c0_33 = arith.constant 0 : index
    %c0_34 = arith.constant 0 : index
    %c0_35 = arith.constant 0 : index
    %39 = vector.load %arg14[%c0_33, %c0_34, %c0_35] : memref<1x1x152xf32, #tpu.memory_space<vmem>>, vector<1x1x152xf32>
    tpu.vector_store %arg14[%c0_33, %c0_34, %c0_35], %38 {strides = array<i32>} : memref<1x1x152xf32, #tpu.memory_space<vmem>>, vector<1x1x152xf32>,
    return
  }
  func.func @transform_0(%arg0: i32) -> (i32, i32) {
    %c0_i32 = arith.constant 0 : i32
    %c0_i32_0 = arith.constant 0 : i32
    return %arg0, %c0_i32 : i32, i32
  }
  func.func @transform_1(%arg0: i32) -> (i32, i32) {
    %c0_i32 = arith.constant 0 : i32
    %c0_i32_0 = arith.constant 0 : i32
    return %arg0, %c0_i32 : i32, i32
  }
  func.func @transform_2(%arg0: i32) -> (i32, i32) {
    %c0_i32 = arith.constant 0 : i32
    %c0_i32_0 = arith.constant 0 : i32
    return %arg0, %c0_i32 : i32, i32
  }
  func.func @transform_3(%arg0: i32) -> (i32, i32) {
    %c0_i32 = arith.constant 0 : i32
    %c0_i32_0 = arith.constant 0 : i32
    %c0_i32_1 = arith.constant 0 : i32
    return %c0_i32, %c0_i32_0 : i32, i32
  }
  func.func @transform_4(%arg0: i32) -> (i32, i32) {
    %c0_i32 = arith.constant 0 : i32
    %c0_i32_0 = arith.constant 0 : i32
    %c0_i32_1 = arith.constant 0 : i32
    return %c0_i32, %c0_i32_0 : i32, i32
  }
  func.func @transform_5(%arg0: i32) -> (i32, i32) {
    %c0_i32 = arith.constant 0 : i32
    %c0_i32_0 = arith.constant 0 : i32
    %c0_i32_1 = arith.constant 0 : i32
    return %c0_i32, %c0_i32_0 : i32, i32
  }
  func.func @transform_6(%arg0: i32) -> (i32, i32) {
    %c0_i32 = arith.constant 0 : i32
    %c0_i32_0 = arith.constant 0 : i32
    %c0_i32_1 = arith.constant 0 : i32
    return %c0_i32, %c0_i32_0 : i32, i32
  }
  func.func @transform_7(%arg0: i32) -> (i32, i32) {
    %c0_i32 = arith.constant 0 : i32
    %c0_i32_0 = arith.constant 0 : i32
    %c0_i32_1 = arith.constant 0 : i32
    return %c0_i32, %c0_i32_0 : i32, i32
  }
  func.func @transform_8(%arg0: i32) -> (i32, i32) {
    %c0_i32 = arith.constant 0 : i32
    %c0_i32_0 = arith.constant 0 : i32
    %c0_i32_1 = arith.constant 0 : i32
    return %c0_i32, %c0_i32_0 : i32, i32
  }
  func.func @transform_9(%arg0: i32) -> (i32, i32) {
    %c0_i32 = arith.constant 0 : i32
    %c0_i32_0 = arith.constant 0 : i32
    %c0_i32_1 = arith.constant 0 : i32
    return %c0_i32, %c0_i32_0 : i32, i32
  }
  func.func @transform_10(%arg0: i32) -> (i32, i32) {
    %c0_i32 = arith.constant 0 : i32
    %c0_i32_0 = arith.constant 0 : i32
    %c0_i32_1 = arith.constant 0 : i32
    return %c0_i32, %c0_i32_0 : i32, i32
  }
  func.func @transform_11(%arg0: i32) -> (i32, i32) {
    %c0_i32 = arith.constant 0 : i32
    %c0_i32_0 = arith.constant 0 : i32
    %c0_i32_1 = arith.constant 0 : i32
    return %c0_i32, %c0_i32_0 : i32, i32
  }
  func.func @transform_12(%arg0: i32) -> (i32, i32) {
    %c0_i32 = arith.constant 0 : i32
    %c0_i32_0 = arith.constant 0 : i32
    %c0_i32_1 = arith.constant 0 : i32
    return %c0_i32, %c0_i32_0 : i32, i32
  }
  func.func @transform_13(%arg0: i32) -> (i32, i32, i32) {
    %c0_i32 = arith.constant 0 : i32
    %c0_i32_0 = arith.constant 0 : i32
    %c0_i32_1 = arith.constant 0 : i32
    return %arg0, %c0_i32, %c0_i32_0 : i32, i32, i32
  }
}

</mosaic_0001>

<bundles_post_ra>
// kernel: tpu_custom_call.1
= control target key start
LH: loop header
LB: loop body
LE: loop exit
PB: predicated region body
PF: predicated region fallthrough
CT: control target
= control target key end

     0   :  { %s2894_s0 = inlined_call_operand.vmem [shape: f32[300,256], index: 0, kind: input, shape index: {}]   ;;  %s2895_s1 = inlined_call_operand.vmem [shape: f32[300,256], index: 1, kind: input, shape index: {}]   ;;  %s2896_s2 = inlined_call_operand.hbm [shape: f32[300,256], index: 2, kind: input, shape index: {}]   ;;  %s2897_s3 = inlined_call_operand.vmem [shape: f32[256,64], index: 3, kind: input, shape index: {}]   ;;  %s2898_s4 = inlined_call_operand.vmem [shape: f32[1,64], index: 4, kind: input, shape index: {}]   ;;  %s2899_s5 = inlined_call_operand.vmem [shape: f32[256,64], index: 5, kind: input, shape index: {}]   ;;  %s2900_s6 = inlined_call_operand.vmem [shape: f32[1,64], index: 6, kind: input, shape index: {}]   ;;  %s2901_s7 = inlined_call_operand.vmem [shape: f32[256,64], index: 7, kind: input, shape index: {}]   ;;  %s2902_s8 = inlined_call_operand.vmem [shape: f32[1,64], index: 8, kind: input, shape index: {}]   ;;  %s2903_s9 = inlined_call_operand.vmem [shape: f32[64,32], index: 9, kind: input, shape index: {}]   ;;  %s2904_s10 = inlined_call_operand.vmem [shape: f32[1,32], index: 10, kind: input, shape index: {}]   ;;  %s2905_s11 = inlined_call_operand.vmem [shape: f32[1,32], index: 11, kind: input, shape index: {}]   ;;  %s2906_s12 = inlined_call_operand.<no memory space> [shape: f32[1,1], index: 12, kind: input, shape index: {}]   ;;  %s2907_s13 = inlined_call_operand.hbm [shape: f32[2,1,152], index: 13, kind: output, shape index: {}]  }
   0x1   :  { %2916 = sst [smem:[#allocation15_spill]] %s2907_s13  ;;  %v18_v0 = vstv %s2906_s12 }
   0x2   :  { %19 = vst [vmem:[#allocation2] sm:$0x1] %v18_v0 }
   0x3   :  { %20 = vsyncpa [#allocation4], 0 }
   0x4   :  { %22 = vsyncpa [#allocation4 + $0x1], 0 }
   0x5   :  { %23 = vsyncpa [#allocation5], 0 }
   0x6   :  { %25 = vsyncpa [#allocation5 + $0x1], 0  ;;  %s2007_s27 = smov 0   ;;  %s2009_s28 = smov 0  }
   0x7   :  { %s2011_s29 = smov 0   ;;  %s2013_s30 = smov 0  }
   0x8 LB: > { %2917 = sst [smem:[#allocation9_spill]] %s1917_s27  ;;  %s2028_s12 = sadd.s32 4294967295, %s1929_s30   ;;  %s1929_s30 = sphi %s2013_s30, %s2931_s30   ;;  %s1925_s29 = sphi %s2011_s29, %s2933_s29   ;;  %s1921_s28 = sphi %s2009_s28, %s2935_s28   ;;  %s1917_s27 = sphi %s2007_s27, %s2934_s27  }
   0x9   : > { %2918 = sst [smem:[#allocation10_spill]] %s1925_s29  ;;  %s1669_s14 = sadd.s32 4294967294, %s1929_s30  }
   0xa   : > { %s2032_s15 = sadd.s32 1, %s1929_s30   ;;  %s90_s16 = sadd.s32 1, %s1925_s29 }
   0xb   : > { %2919 = sst [smem:[#allocation11_spill]] %s2032_s15  ;;  %s87_s17 = ssub.s32 %s1929_s30, %s2032_s15 }
   0xc   : > { %p97_p0 = scmp.ne.s32.totalorder %s1925_s29, %s1921_s28  ;;  %p88_p1 = scmp.eq.s32.totalorder %s87_s17, 0 }
   0xd   : > { %p98_p2 = scmp.eq.s32.totalorder %s1929_s30, 0  ;;  %p103_p3 = scmp.ne.s32.totalorder %s1921_s28, %s1917_s27 }
   0xe   : > { %p104_p4 = scmp.eq.s32.totalorder %s2028_s12, 0  ;;  %p337_p7 = scmp.eq.s32.totalorder %s2028_s12, 1 }
   0xf   : > { %s2044_s18 = scalar_select %p88_p1, %s1925_s29, %s90_s16  }
  0x10   : > { %p99_p5 = por %p98_p2, %p97_p0  ;;  %p2046_p6 = por %p104_p4, %p103_p3 }
  0x11   : > { %2920 = sst [smem:[#allocation12_spill]] %s2044_s18  ;;  %p343_p8 = scmp.eq.s32.totalorder %s1669_s14, 1 }
  0x12   : > { %p1671_p9 = scmp.ge.s32.totalorder %s1929_s30, 2  ;;  %p1791_p10 = scmp.lt.s32.totalorder %s1929_s30, 2 }
  0x13   : > { %p2053_p11 = por %p337_p7, %p97_p0  ;;  %p2057_p12 = por %p343_p8, %p103_p3 }
  0x14   : > { %s413_s22 = sand.u32 1, %s1925_s29   ;;  %s1728_s23 = smul.u32 304, %s1929_s30 }
  0x15   : > { %s2922_s20 = scalar_select %p2053_p11, 1, 0 }
  0x16   : > { %s2924_s21 = scalar_select %p2057_p12, 1, 0 }
  0x17   : > { %2923 = sst [smem:[#allocation13_spill]] %s2922_s20  ;;  %s1777_s24 = smul.u32 304, %s413_s22 }
  0x18   : > { %2925 = sst [smem:[#allocation14_spill]] %s2924_s21  ;;  %s423_s16 = scalar_lea.hbm %s2896_s2, %s1728_s23 }
  0x19   : > { %p2066_p13 = pnand %p1791_p10, %p99_p5  ;;  %s424_s14 = sshll.u32 %s423_s16, 4  ;;  %s425_s14 = int_to_ptr.hbm [resolvable:$true] %s424_s14 }
  0x1a   : > { %s417_s18 = scalar_lea.vmem [#allocation3], %s1777_s24  ;;  %s414_s27 = scalar_lea.sflag [#allocation4], %s413_s22 }
  0x1b   : > { %s426_s15 = sshll.u32 %s417_s18, 4  ;;  %s1833_s20 = sshra.s32 %s425_s14, 4  ;;  %s427_s15 = int_to_ptr.vmem [resolvable:$true] %s426_s15  ;;  %s1834_s20 = int_to_ptr.hbm [resolvable:$true] %s1833_s20 }
  0x1c   : > { %s1835_s29 = scalar_lea.hbm %s1834_s20, 304  ;;  %p1837_p1 = pneg %p2066_p13 }
  0x1d   : > { %p1836_p0 = scmp.ne.s32.totalorder %s1834_s20, %s1835_s29  ;;  %s1840_s26 = scalar_lea.hbm %s2896_s2, 608 }
  0x1e   : > { %p1841_p4 = scmp.lt.s32.totalorder %s1834_s20, %s2896_s2  ;;  %p1842_p5 = scmp.lt.s32.totalorder %s1840_s26, %s1835_s29 }
  0x1f   : > { %p1838_p2 = pnand %p1837_p1, %p1836_p0 }
  0x20   : > { %p1843_p7 = por %p1842_p5, %p1841_p4 }
  0x21   : > { %p1839_p3 = pneg %p1838_p2 }
  0x23   : > { %p1844_p8 = pnand %p1843_p7, %p1839_p3 }
  0x25   : > { %1847 = shalt.err (!%p1844_p8)
}
  0x26   : > { %s1931_s18 = smov 256   ;;  %s1932_s22 = smov 16  }
  0x27   : > { %1786 = dma.hbm_to_vmem [thread:$0]  (!%p2066_p13), %s425_s14, 4864, %s427_s15, %s414_s27, %s1931_s18, %s1931_s18, %s1932_s22  }
  0x28   : > { %p1674_p10 = scmp.ge.s32.totalorder %s1929_s30, 1  ;;  %p434_p0 = scmp.lt.s32.totalorder %s1929_s30, 3 }
  0x2a   : > { %p435_p1 = pnand %p1674_p10, %p434_p0 }
  0x2b   : > { %s2083_s24 = sand.u32 (!%p435_p1), 1, %s1921_s28  }
  0x2c   : > { %438 = sbr.rel (%p435_p1) target bundleno = 807 (0x327), region = 72  ;;  %s441_s29 = scalar_lea.sflag (!%p435_p1), [#allocation4], %s2083_s24 }
  0x2d   : > { %s1778_s13 = smul.u32 (!%p435_p1), 304, %s2083_s24 }
  0x2f   : > { %s2087_s20 = scalar_lea.vmem (!%p435_p1), [#allocation3], %s1778_s13 }
  0x31   : > { %1908 = dma.done.wait (%p2046_p6), %s441_s29, 4864  }
  0x32   : > { %1910 = vsyncadd (%p2046_p6), %s441_s29, 4294962432  ;;  %v644_v1 = vld [vmem:[%s2897_s3 + $0x78] sm:$0xff]  ;;  %v643_v2 = vld [vmem:[%s2897_s3 + $0x70] sm:$0xff]  ;;  %s500_s27 = smul.u32 19, %s2028_s12  ;;  %vm1288_vm0 = vcmask 523264   ;;  %vm1447_vm1 = vcmask 261120  }
  0x33   : > { %v2102_v3 = vld [vmem:[%s2897_s3 + $0xf8] sm:$0xff]  ;;  %665 = vmatpush.msra.mxu0 %v644_v1  ;;  %1729 = vmatpush.msra.mxu3 %v644_v1  ;;  %v2107_v4 = vld [vmem:[%s2897_s3 + $0xf0] sm:$0xff]  ;;  %v642_v5 = vld [vmem:[%s2897_s3 + $0x68] sm:$0xff]  ;;  %s1675_s21 = sshll.u32 %s2083_s24, 1  ;;  %s1721_s16 = sshll.u32 %s2028_s12, 1  ;;  %vm1551_vm2 = vcmask 1040384  }
  0x34   : > { %739 = vmatpush.msra.mxu1 %v2102_v3  ;;  %v2116_v6 = vld [vmem:[%s2897_s3 + $0xe8] sm:$0xff]  ;;  %v641_v7 = vld [vmem:[%s2897_s3 + $0x60] sm:$0xff]  ;;  %v640_v9 = vld [vmem:[%s2897_s3 + $0x58] sm:$0xff]  ;;  %p501_p6 = scmp.lt.s32.totalorder %s500_s27, 37  ;;  %s2927_s14 = sld [smem:[#allocation15_spill]] }
  0x35   : > { %666 = vmatpush.msra.mxu0 %v643_v2  ;;  %1730 = vmatpush.msra.mxu3 %v643_v2  ;;  %v2125_v8 = vld [vmem:[%s2897_s3 + $0xe0] sm:$0xff]  ;;  %v2134_v10 = vld [vmem:[%s2897_s3 + $0xd8] sm:$0xff]  ;;  %v639_v11 = vld [vmem:[%s2897_s3 + $0x50] sm:$0xff]  ;;  %s499_s26 = scalar_lea.vmem [#allocation6], %s1675_s21  ;;  %s1560_s12 = scalar_lea.sflag [#allocation5], %s2083_s24 }
  0x36   : > { %740 = vmatpush.msra.mxu1 %v2107_v4  ;;  %v2143_v12 = vld [vmem:[%s2897_s3 + $0xd0] sm:$0xff]  ;;  %v638_v13 = vld [vmem:[%s2897_s3 + $0x48] sm:$0xff]  ;;  %v637_v15 = vld [vmem:[%s2897_s3 + $0x40] sm:$0xff]  ;;  %s2937_s27 = smov (!%p501_p6, %s500_s27), 37  ;;  %s1572_s22 = sshll.u32 %s499_s26, 4  ;;  %s1573_s22 = int_to_ptr.vmem [resolvable:$true] %s1572_s22 }
  0x37   : > { %667 = vmatpush.msra.mxu0 %v642_v5  ;;  %1731 = vmatpush.msra.mxu3 %v642_v5  ;;  %v2152_v14 = vld [vmem:[%s2897_s3 + $0xc8] sm:$0xff]  ;;  %v2162_v16 = vld [vmem:[%s2897_s3 + $0xc0] sm:$0xff]  ;;  %v636_v17 = vld [vmem:[%s2897_s3 + $0x38] sm:$0xff]  ;;  %s1726_s13 = sshll.u32 %s2937_s27, 4 }
  0x38   : > { %741 = vmatpush.msra.mxu1 %v2116_v6  ;;  %v2171_v18 = vld [vmem:[%s2897_s3 + $0xb8] sm:$0xff]  ;;  %v635_v19 = vld [vmem:[%s2897_s3 + $0x30] sm:$0xff]  ;;  %v634_v21 = vld [vmem:[%s2897_s3 + $0x28] sm:$0xff]  ;;  %s2230_s19 = scalar_lea.vmem %s2894_s0, %s1726_s13  ;;  %s2356_s23 = scalar_lea.vmem %s2895_s1, %s1726_s13 }
  0x39   : > { %668 = vmatpush.msra.mxu0 %v641_v7  ;;  %1732 = vmatpush.msra.mxu3 %v641_v7  ;;  %v2180_v20 = vld [vmem:[%s2897_s3 + $0xb0] sm:$0xff]  ;;  %v2189_v22 = vld [vmem:[%s2897_s3 + $0xa8] sm:$0xff]  ;;  %v633_v23 = vld [vmem:[%s2897_s3 + $0x20] sm:$0xff] }
  0x3a   : > { %742 = vmatpush.msra.mxu1 %v2125_v8  ;;  %v2200_v24 = vld [vmem:[%s2897_s3 + $0xa0] sm:$0xff]  ;;  %v632_v25 = vld [vmem:[%s2897_s3 + $0x18] sm:$0xff]  ;;  %v631_v27 = vld [vmem:[%s2897_s3 + $0x10] sm:$0xff]  ;;  %s1570_s25 = scalar_lea.hbm %s2927_s14, %s1721_s16  ;;  %s1883_s15 = scalar_lea.hbm %s2927_s14, 4 }
  0x3b   : > { %669 = vmatpush.msra.mxu0 %v640_v9  ;;  %1733 = vmatpush.msra.mxu3 %v640_v9  ;;  %v2209_v26 = vld [vmem:[%s2897_s3 + $0x98] sm:$0xff]  ;;  %v2219_v28 = vld [vmem:[%s2897_s3 + $0x90] sm:$0xff]  ;;  %v630_v29 = vld [vmem:[%s2897_s3 + $0x8] sm:$0xff] }
  0x3c   : > { %743 = vmatpush.msra.mxu1 %v2134_v10  ;;  %v2235_v30 = vld [vmem:[%s2897_s3 + $0x88] sm:$0xff]  ;;  %v629_v31 = vld [vmem:[%s2897_s3] sm:$0xff]  ;;  %v545_v33 = vld [vmem:[%s2230_s19 + $0xf0] sm:$0xff] }
  0x3d   : > { %670 = vmatpush.msra.mxu0 %v639_v11  ;;  %1734 = vmatpush.msra.mxu3 %v639_v11  ;;  %v515_v32 = vld [vmem:[%s2230_s19] sm:$0xff]  ;;  %v516_v35 = vld [vmem:[%s2230_s19 + $0x8] sm:$0xff]  ;;  %v2255_v36 = vld [vmem:[%s2899_s5 + $0x78] sm:$0xff] }
  0x3e   : > { %744 = vmatpush.msra.mxu1 %v2143_v12  ;;  %v2247_v34 = vld [vmem:[%s2897_s3 + $0x80] sm:$0xff]  ;;  %868 = vmatpush.msra.mxu2 %v2255_v36  ;;  %v2262_v37 = vld [vmem:[%s2899_s5 + $0x70] sm:$0xff]  ;;  %v2271_v40 = vld [vmem:[%s2899_s5 + $0x68] sm:$0xff] }
  0x3f   : > { %671 = vmatpush.msra.mxu0 %v638_v13  ;;  %1735 = vmatpush.msra.mxu3 %v638_v13  ;;  %v517_v38 = vld [vmem:[%s2230_s19 + $0x10] sm:$0xff]  ;;  %v547_v39 = vld [vmem:[%s2230_s19 + $0x100] sm:$0xff]  ;;  %v518_v41 = vld [vmem:[%s2230_s19 + $0x18] sm:$0xff] }
  0x40   : > { %745 = vmatpush.msra.mxu1 %v2152_v14  ;;  %869 = vmatpush.msra.mxu2 %v2262_v37  ;;  %v844_v42 = vld [vmem:[%s2899_s5 + $0x60] sm:$0xff]  ;;  %v843_v43 = vld [vmem:[%s2899_s5 + $0x58] sm:$0xff]  ;;  %v842_v44 = vld [vmem:[%s2899_s5 + $0x50] sm:$0xff] }
  0x41   : > { %672 = vmatpush.msra.mxu0 %v637_v15  ;;  %1736 = vmatpush.msra.mxu3 %v637_v15  ;;  %v519_v45 = vld [vmem:[%s2230_s19 + $0x20] sm:$0xff]  ;;  %v549_v46 = vld [vmem:[%s2230_s19 + $0x110] sm:$0xff]  ;;  %v841_v47 = vld [vmem:[%s2899_s5 + $0x48] sm:$0xff] }
  0x42   : > { %746 = vmatpush.msra.mxu1 %v2162_v16  ;;  %870 = vmatpush.msra.mxu2 %v2271_v40  ;;  %v520_v48 = vld [vmem:[%s2230_s19 + $0x28] sm:$0xff]  ;;  %v840_v49 = vld [vmem:[%s2899_s5 + $0x40] sm:$0xff]  ;;  %v839_v50 = vld [vmem:[%s2899_s5 + $0x38] sm:$0xff] }
  0x43   : > { %673 = vmatpush.msra.mxu0 %v636_v17  ;;  %1737 = vmatpush.msra.mxu3 %v636_v17  ;;  %v838_v51 = vld [vmem:[%s2899_s5 + $0x30] sm:$0xff]  ;;  %v551_v53 = vld [vmem:[%s2230_s19 + $0x120] sm:$0xff]  ;;  %v837_v54 = vld [vmem:[%s2899_s5 + $0x28] sm:$0xff] }
  0x44   : > { %747 = vmatpush.msra.mxu1 %v2171_v18  ;;  %871 = vmatpush.msra.mxu2 %v844_v42  ;;  %v521_v52 = vld [vmem:[%s2230_s19 + $0x30] sm:$0xff]  ;;  %v522_v55 = vld [vmem:[%s2230_s19 + $0x38] sm:$0xff]  ;;  %v836_v56 = vld [vmem:[%s2899_s5 + $0x20] sm:$0xff] }
  0x45   : > { %674 = vmatpush.msra.mxu0 %v635_v19  ;;  %1738 = vmatpush.msra.mxu3 %v635_v19  ;;  %v835_v57 = vld [vmem:[%s2899_s5 + $0x18] sm:$0xff]  ;;  %v834_v58 = vld [vmem:[%s2899_s5 + $0x10] sm:$0xff]  ;;  %v523_v59 = vld [vmem:[%s2230_s19 + $0x40] sm:$0xff] }
  0x46   : > { %748 = vmatpush.msra.mxu1 %v2180_v20  ;;  %872 = vmatpush.msra.mxu2 %v843_v43  ;;  %v546_v60 = vld [vmem:[%s2230_s19 + $0xf8] sm:$0xff]  ;;  %v833_v61 = vld [vmem:[%s2899_s5 + $0x8] sm:$0xff]  ;;  %v832_v63 = vld [vmem:[%s2899_s5] sm:$0xff] }
  0x47   : > { %675 = vmatpush.msra.mxu0 %v634_v21  ;;  %1739 = vmatpush.msra.mxu3 %v634_v21  ;;  %v524_v62 = vld [vmem:[%s2230_s19 + $0x48] sm:$0xff]  ;;  %v525_v0 = vld [vmem:[%s2230_s19 + $0x50] sm:$0xff]  ;;  %v526_v2 = vld [vmem:[%s2230_s19 + $0x58] sm:$0xff] }
  0x48   : > { %749 = vmatpush.msra.mxu1 %v2189_v22  ;;  %873 = vmatpush.msra.mxu2 %v842_v44  ;;  %v548_v1 = vld [vmem:[%s2230_s19 + $0x108] sm:$0xff]  ;;  %v1050_v9 = vld [vmem:[%s2901_s7 + $0x78] sm:$0xff]  ;;  %v1065_v13 = vld [vmem:[%s2901_s7 + $0xf0] sm:$0xff] }
  0x49   : > { %676 = vmatpush.msra.mxu0 %v633_v23  ;;  %1740 = vmatpush.msra.mxu3 %v633_v23  ;;  %v528_v5 = vld [vmem:[%s2230_s19 + $0x68] sm:$0xff]  ;;  %v1066_v11 = vld [vmem:[%s2901_s7 + $0xf8] sm:$0xff]  ;;  %v583_v15 = vld [vmem:[%s2356_s23 + $0xf0] sm:$0xff] }
  0x4a   : > { %750 = vmatpush.msra.mxu1 %v2200_v24  ;;  %874 = vmatpush.msra.mxu2 %v841_v47  ;;  %v552_v7 = vld [vmem:[%s2230_s19 + $0x128] sm:$0xff]  ;;  %v863_v17 = vld [vmem:[%s2899_s5 + $0xf8] sm:$0xff]  ;;  %v862_v21 = vld [vmem:[%s2899_s5 + $0xf0] sm:$0xff] }
  0x4b   : > { %677 = vmatpush.msra.mxu0 %v632_v25  ;;  %1741 = vmatpush.msra.mxu3 %v632_v25  ;;  %v1064_v19 = vld [vmem:[%s2901_s7 + $0xe8] sm:$0xff]  ;;  %v1063_v23 = vld [vmem:[%s2901_s7 + $0xe0] sm:$0xff]  ;;  %v1045_v25 = vld [vmem:[%s2901_s7 + $0x50] sm:$0xff] }
  0x4c   : > { %751 = vmatpush.msra.mxu1 %v2209_v26  ;;  %875 = vmatpush.msra.mxu2 %v840_v49 }
  0x4d   : > { %678 = vmatpush.msra.mxu0 %v631_v27  ;;  %1742 = vmatpush.msra.mxu3 %v631_v27  ;;  %v1044_v27 = vld [vmem:[%s2901_s7 + $0x48] sm:$0xff] }
  0x4e   : > { %752 = vmatpush.msra.mxu1 %v2219_v28  ;;  %876 = vmatpush.msra.mxu2 %v839_v50 }
  0x4f   : > { %679 = vmatpush.msra.mxu0 %v630_v29  ;;  %1743 = vmatpush.msra.mxu3 %v630_v29  ;;  %v860_v29 = vld [vmem:[%s2899_s5 + $0xe0] sm:$0xff] }
  0x50   : > { %753 = vmatpush.msra.mxu1 %v2235_v30  ;;  %877 = vmatpush.msra.mxu2 %v838_v51 }
  0x51   : > { %680 = vmatpush.msra.mxu0 %v629_v31  ;;  %1744 = vmatpush.msra.mxu3 %v629_v31  ;;  %v533_v31 = vld [vmem:[%s2230_s19 + $0x90] sm:$0xff] }
  0x52   : > { %681 = vmatmul.f32.vlgmr.msra.gmra.mxu0 %v515_v32  ;;  %726 = vmatmul.f32.vlgmr.msra.gmra.mxu3 %v545_v33  ;;  %v585_v32 = vld [vmem:[%s2356_s23 + $0x100] sm:$0xff]  ;;  %v859_v33 = vld [vmem:[%s2899_s5 + $0xd8] sm:$0xff] }
  0x53   : > { %1745 = vmatpush.msrb.mxu3 %v2102_v3  ;;  %754 = vmatpush.msra.mxu1 %v2247_v34  ;;  %v527_v3 = vld [vmem:[%s2230_s19 + $0x60] sm:$0xff] }
  0x54   : > { %755 = vmatmul.f32.vlgmr.msra.gmra.mxu1 %v516_v35  ;;  %878 = vmatpush.msra.mxu2 %v837_v54  ;;  %v534_v35 = vld [vmem:[%s2230_s19 + $0x98] sm:$0xff] }
  0x55   : > { %1746 = vmatpush.msrb.mxu3 %v2107_v4  ;;  %v550_v4 = vld [vmem:[%s2230_s19 + $0x118] sm:$0xff]  ;;  %1071 = vmatpush.msrb.mxu0 %v1050_v9  ;;  %v554_v9 = vld [vmem:[%s2356_s23 + $0x8] sm:$0xff] }
  0x56   : > { %879 = vmatpush.msra.mxu2 %v836_v56  ;;  %1145 = vmatpush.msrb.mxu1 %v1066_v11  ;;  %v1051_v11 = vld [vmem:[%s2901_s7 + $0x80] sm:$0xff] }
  0x57   : > { %1747 = vmatpush.msrb.mxu3 %v2116_v6  ;;  %v529_v6 = vld [vmem:[%s2230_s19 + $0x70] sm:$0xff] }
  0x58   : > { %880 = vmatpush.msra.mxu2 %v835_v57  ;;  %1146 = vmatpush.msrb.mxu1 %v1065_v13  ;;  %v541_v13 = vld [vmem:[%s2230_s19 + $0xd0] sm:$0xff] }
  0x59   : > { %1748 = vmatpush.msrb.mxu3 %v2125_v8  ;;  %v530_v8 = vld [vmem:[%s2230_s19 + $0x78] sm:$0xff] }
  0x5a   : > { %684 = vmatmul.f32.gmra.mxu0 %v517_v38  ;;  %729 = vmatmul.f32.gmra.mxu3 %v547_v39  ;;  %v1042_v38 = vld [vmem:[%s2901_s7 + $0x38] sm:$0xff]  ;;  %v857_v39 = vld [vmem:[%s2899_s5 + $0xc8] sm:$0xff] }
  0x5b   : > { %1749 = vmatpush.msrb.mxu3 %v2134_v10  ;;  %881 = vmatpush.msra.mxu2 %v834_v58  ;;  %v1049_v10 = vld [vmem:[%s2901_s7 + $0x70] sm:$0xff] }
  0x5c   : > { %758 = vmatmul.f32.gmra.mxu1 %v518_v41  ;;  %1072 = vmatpush.msrb.mxu0 %v1049_v10  ;;  %v1041_v41 = vld [vmem:[%s2901_s7 + $0x30] sm:$0xff]  ;;  %v561_v10 = vld [vmem:[%s2356_s23 + $0x40] sm:$0xff] }
  0x5d   : > { %1750 = vmatpush.msrb.mxu3 %v2143_v12  ;;  %882 = vmatpush.msra.mxu2 %v833_v61  ;;  %v1048_v12 = vld [vmem:[%s2901_s7 + $0x68] sm:$0xff] }
  0x5e   : > { %1073 = vmatpush.msrb.mxu0 %v1048_v12  ;;  %1147 = vmatpush.msrb.mxu1 %v1064_v19  ;;  %v540_v12 = vld [vmem:[%s2230_s19 + $0xc8] sm:$0xff]  ;;  %v565_v19 = vld [vmem:[%s2356_s23 + $0x60] sm:$0xff] }
  0x5f   : > { %1751 = vmatpush.msrb.mxu3 %v2152_v14  ;;  %883 = vmatpush.msra.mxu2 %v832_v63  ;;  %v531_v14 = vld [vmem:[%s2230_s19 + $0x80] sm:$0xff] }
  0x60   : > { %1148 = vmatpush.msrb.mxu1 %v1063_v23  ;;  %v567_v23 = vld [vmem:[%s2356_s23 + $0x70] sm:$0xff] }
  0x61   : > { %1752 = vmatpush.msrb.mxu3 %v2162_v16  ;;  %v553_v16 = vld [vmem:[%s2356_s23] sm:$0xff] }
  0x62   : > { %687 = vmatmul.f32.gmra.mxu0 %v519_v45  ;;  %732 = vmatmul.f32.gmra.mxu3 %v549_v46  ;;  %v535_v45 = vld [vmem:[%s2230_s19 + $0xa0] sm:$0xff]  ;;  %v587_v46 = vld [vmem:[%s2356_s23 + $0x110] sm:$0xff] }
  0x63   : > { %1753 = vmatpush.msrb.mxu3 %v2171_v18  ;;  %884 = vmatmul.f32.vlgmr.msra.gmra.mxu2 %v553_v16  ;;  %v1047_v18 = vld [vmem:[%s2901_s7 + $0x60] sm:$0xff]  ;;  %v542_v16 = vld [vmem:[%s2230_s19 + $0xd8] sm:$0xff] }
  0x64   : > { %761 = vmatmul.f32.gmra.mxu1 %v520_v48  ;;  %1074 = vmatpush.msrb.mxu0 %v1047_v18  ;;  %v1040_v48 = vld [vmem:[%s2901_s7 + $0x28] sm:$0xff] }
  0x65   : > { %1754 = vmatpush.msrb.mxu3 %v2180_v20  ;;  %v532_v20 = vld [vmem:[%s2230_s19 + $0x88] sm:$0xff] }
  0x66   : > { %v558_v18 = vld [vmem:[%s2356_s23 + $0x28] sm:$0xff] }
  0x67   : > { %1755 = vmatpush.msrb.mxu3 %v2189_v22  ;;  %v1046_v22 = vld [vmem:[%s2901_s7 + $0x58] sm:$0xff] }
  0x68   : > { %1075 = vmatpush.msrb.mxu0 %v1046_v22  ;;  %v591_v22 = vld [vmem:[%s2087_s20] sm:$0xff] }
  0x69   : > { %1756 = vmatpush.msrb.mxu3 %v2200_v24  ;;  %v861_v24 = vld [vmem:[%s2899_s5 + $0xe8] sm:$0xff] }
  0x6a   : > { %690 = vmatmul.f32.gmra.mxu0 %v521_v52  ;;  %735 = vmatmul.f32.gmra.mxu3 %v551_v53  ;;  %v1039_v52 = vld [vmem:[%s2901_s7 + $0x20] sm:$0xff]  ;;  %v853_v53 = vld [vmem:[%s2899_s5 + $0xa8] sm:$0xff] }
  0x6b   : > { %1757 = vmatpush.msrb.mxu3 %v2209_v26  ;;  %v1062_v26 = vld [vmem:[%s2901_s7 + $0xd8] sm:$0xff]  ;;  %1076 = vmatpush.msrb.mxu0 %v1045_v25 }
  0x6c   : > { %764 = vmatmul.f32.gmra.mxu1 %v522_v55  ;;  %v1038_v55 = vld [vmem:[%s2901_s7 + $0x18] sm:$0xff] }
  0x6d   : > { %1758 = vmatpush.msrb.mxu3 %v2219_v28  ;;  %v555_v28 = vld [vmem:[%s2356_s23 + $0x10] sm:$0xff]  ;;  %1149 = vmatpush.msrb.mxu1 %v1062_v26  ;;  %v562_v26 = vld [vmem:[%s2356_s23 + $0x48] sm:$0xff] }
  0x6e   : > { %1077 = vmatpush.msrb.mxu0 %v1044_v27  ;;  %887 = vmatmul.f32.gmra.mxu2 %v555_v28  ;;  %v593_v27 = vld [vmem:[%s2087_s20 + $0x10] sm:$0xff] }
  0x6f   : > { %1759 = vmatpush.msrb.mxu3 %v2235_v30  ;;  %v1061_v30 = vld [vmem:[%s2901_s7 + $0xd0] sm:$0xff]  ;;  %v569_v28 = vld [vmem:[%s2356_s23 + $0x80] sm:$0xff] }
  0x70   : > { %1150 = vmatpush.msrb.mxu1 %v1061_v30  ;;  %v594_v30 = vld [vmem:[%s2087_s20 + $0x18] sm:$0xff] }
  0x71   : > { %1760 = vmatpush.msrb.mxu3 %v2247_v34  ;;  %v1043_v34 = vld [vmem:[%s2901_s7 + $0x40] sm:$0xff] }
  0x72   : > { %693 = vmatmul.f32.gmra.mxu0 %v523_v59  ;;  %800 = vmatmul.f32.vlgmr.msrb.gmra.mxu3 %v546_v60  ;;  %v537_v59 = vld [vmem:[%s2230_s19 + $0xb0] sm:$0xff]  ;;  %v589_v60 = vld [vmem:[%s2356_s23 + $0x120] sm:$0xff] }
  0x73   : > { %1761 = vmatpush.msra.mxu3 %v2255_v36  ;;  %v858_v36 = vld [vmem:[%s2899_s5 + $0xd0] sm:$0xff]  ;;  %1078 = vmatpush.msrb.mxu0 %v1043_v34 }
  0x74   : > { %767 = vmatmul.f32.gmra.mxu1 %v524_v62  ;;  %v1037_v62 = vld [vmem:[%s2901_s7 + $0x10] sm:$0xff] }
  0x75   : > { %1762 = vmatpush.msra.mxu3 %v2262_v37  ;;  %v1060_v37 = vld [vmem:[%s2901_s7 + $0xc8] sm:$0xff]  ;;  %1079 = vmatpush.msrb.mxu0 %v1042_v38 }
  0x76   : > { %1151 = vmatpush.msrb.mxu1 %v1060_v37  ;;  %v595_v34 = vld [vmem:[%s2087_s20 + $0x20] sm:$0xff]  ;;  %v596_v37 = vld [vmem:[%s2087_s20 + $0x28] sm:$0xff] }
  0x77   : > { %1763 = vmatpush.msra.mxu3 %v2271_v40  ;;  %v1059_v40 = vld [vmem:[%s2901_s7 + $0xc0] sm:$0xff]  ;;  %1080 = vmatpush.msrb.mxu0 %v1041_v41 }
  0x78   : > { %1152 = vmatpush.msrb.mxu1 %v1059_v40  ;;  %v566_v40 = vld [vmem:[%s2356_s23 + $0x68] sm:$0xff] }
  0x79   : > { %1764 = vmatpush.msra.mxu3 %v844_v42  ;;  %v557_v42 = vld [vmem:[%s2356_s23 + $0x20] sm:$0xff]  ;;  %1081 = vmatpush.msrb.mxu0 %v1040_v48 }
  0x7a   : > { %696 = vmatmul.f32.gmra.mxu0 %v525_v0  ;;  %803 = vmatmul.f32.gmra.mxu3 %v548_v1  ;;  %v850_v0 = vld [vmem:[%s2899_s5 + $0x90] sm:$0xff]  ;;  %v1054_v1 = vld [vmem:[%s2901_s7 + $0x98] sm:$0xff] }
  0x7b   : > { %1765 = vmatpush.msra.mxu3 %v843_v43  ;;  %v856_v43 = vld [vmem:[%s2899_s5 + $0xc0] sm:$0xff]  ;;  %890 = vmatmul.f32.gmra.mxu2 %v557_v42 }
  0x7c   : > { %770 = vmatmul.f32.gmra.mxu1 %v526_v2  ;;  %1082 = vmatpush.msrb.mxu0 %v1039_v52  ;;  %v1036_v2 = vld [vmem:[%s2901_s7 + $0x8] sm:$0xff]  ;;  %v573_v42 = vld [vmem:[%s2356_s23 + $0xa0] sm:$0xff] }
  0x7d   : > { %1766 = vmatpush.msra.mxu3 %v842_v44  ;;  %v1058_v44 = vld [vmem:[%s2901_s7 + $0xb8] sm:$0xff] }
  0x7e   : > { %1153 = vmatpush.msrb.mxu1 %v1058_v44  ;;  %1083 = vmatpush.msrb.mxu0 %v1038_v55  ;;  %v597_v41 = vld [vmem:[%s2087_s20 + $0x30] sm:$0xff]  ;;  %v598_v44 = vld [vmem:[%s2087_s20 + $0x38] sm:$0xff]  ;;  %v599_v48 = vld [vmem:[%s2087_s20 + $0x40] sm:$0xff] }
  0x7f   : > { %1767 = vmatpush.msra.mxu3 %v841_v47  ;;  %v855_v47 = vld [vmem:[%s2899_s5 + $0xb8] sm:$0xff] }
  0x80   : > { %1084 = vmatpush.msrb.mxu0 %v1037_v62  ;;  %v601_v55 = vld [vmem:[%s2087_s20 + $0x50] sm:$0xff] }
  0x81   : > { %1768 = vmatpush.msra.mxu3 %v840_v49  ;;  %v536_v49 = vld [vmem:[%s2230_s19 + $0xa8] sm:$0xff] }
  0x82   : > { %699 = vmatmul.f32.gmra.mxu0 %v527_v3  ;;  %806 = vmatmul.f32.gmra.mxu3 %v550_v4  ;;  %v849_v3 = vld [vmem:[%s2899_s5 + $0x88] sm:$0xff]  ;;  %v1053_v4 = vld [vmem:[%s2901_s7 + $0x90] sm:$0xff] }
  0x83   : > { %1769 = vmatpush.msra.mxu3 %v839_v50  ;;  %v854_v50 = vld [vmem:[%s2899_s5 + $0xb0] sm:$0xff]  ;;  %1085 = vmatpush.msrb.mxu0 %v1036_v2 }
  0x84   : > { %773 = vmatmul.f32.gmra.mxu1 %v528_v5  ;;  %v1035_v5 = vld [vmem:[%s2901_s7] sm:$0xff]  ;;  %v579_v2 = vld [vmem:[%s2356_s23 + $0xd0] sm:$0xff] }
  0x85   : > { %1770 = vmatpush.msra.mxu3 %v838_v51  ;;  %v1057_v51 = vld [vmem:[%s2901_s7 + $0xb0] sm:$0xff]  ;;  %1086 = vmatpush.msrb.mxu0 %v1035_v5 }
  0x86   : > { %1154 = vmatpush.msrb.mxu1 %v1057_v51  ;;  %v600_v51 = vld [vmem:[%s2087_s20 + $0x48] sm:$0xff] }
  0x87   : > { %1771 = vmatpush.msra.mxu3 %v837_v54  ;;  %v1056_v54 = vld [vmem:[%s2901_s7 + $0xa8] sm:$0xff] }
  0x88   : > { %1155 = vmatpush.msrb.mxu1 %v1056_v54  ;;  %v570_v54 = vld [vmem:[%s2356_s23 + $0x88] sm:$0xff] }
  0x89   : > { %1772 = vmatpush.msra.mxu3 %v836_v56  ;;  %v559_v56 = vld [vmem:[%s2356_s23 + $0x30] sm:$0xff] }
  0x8a   : > { %702 = vmatmul.f32.gmra.mxu0 %v529_v6  ;;  %809 = vmatmul.f32.gmra.mxu3 %v552_v7  ;;  %v848_v6 = vld [vmem:[%s2899_s5 + $0x80] sm:$0xff]  ;;  %v1052_v7 = vld [vmem:[%s2901_s7 + $0x88] sm:$0xff] }
  0x8b   : > { %1773 = vmatpush.msra.mxu3 %v835_v57  ;;  %v852_v57 = vld [vmem:[%s2899_s5 + $0xa0] sm:$0xff]  ;;  %893 = vmatmul.f32.gmra.mxu2 %v559_v56 }
  0x8c   : > { %776 = vmatmul.f32.gmra.mxu1 %v530_v8  ;;  %v539_v8 = vld [vmem:[%s2230_s19 + $0xc0] sm:$0xff] }
  0x8d   : > { %1774 = vmatpush.msra.mxu3 %v834_v58  ;;  %v1055_v58 = vld [vmem:[%s2901_s7 + $0xa0] sm:$0xff] }
  0x8e   : > { %1156 = vmatpush.msrb.mxu1 %v1055_v58  ;;  %v577_v56 = vld [vmem:[%s2356_s23 + $0xc0] sm:$0xff] }
  0x8f   : > { %1775 = vmatpush.msra.mxu3 %v833_v61  ;;  %v851_v61 = vld [vmem:[%s2899_s5 + $0x98] sm:$0xff] }
  0x90   : > { %1157 = vmatpush.msrb.mxu1 %v1054_v1  ;;  %v602_v58 = vld [vmem:[%s2087_s20 + $0x58] sm:$0xff]  ;;  %v603_v1 = vld [vmem:[%s2087_s20 + $0x60] sm:$0xff] }
  0x91   : > { %1776 = vmatpush.msra.mxu3 %v832_v63  ;;  %v538_v63 = vld [vmem:[%s2230_s19 + $0xb8] sm:$0xff] }
  0x92   : > { %705 = vmatmul.f32.gmra.mxu0 %v531_v14  ;;  %929 = vmatmul.f32.vlgmr.msra.gmra.mxu3 %v583_v15  ;;  %v556_v14 = vld [vmem:[%s2356_s23 + $0x18] sm:$0xff]  ;;  %v563_v15 = vld [vmem:[%s2356_s23 + $0x50] sm:$0xff] }
  0x93   : > { %942 = vmatpush.msrb.mxu3 %v863_v17  ;;  %1158 = vmatpush.msrb.mxu1 %v1053_v4  ;;  %v543_v17 = vld [vmem:[%s2230_s19 + $0xe0] sm:$0xff] }
  0x94   : > { %779 = vmatmul.f32.gmra.mxu1 %v532_v20  ;;  %896 = vmatmul.f32.gmra.mxu2 %v561_v10  ;;  %v544_v20 = vld [vmem:[%s2230_s19 + $0xe8] sm:$0xff] }
  0x95   : > { %943 = vmatpush.msrb.mxu3 %v862_v21  ;;  %1159 = vmatpush.msrb.mxu1 %v1052_v7  ;;  %v560_v21 = vld [vmem:[%s2356_s23 + $0x38] sm:$0xff] }
  0x96   : > { %v604_v4 = vld [vmem:[%s2087_s20 + $0x68] sm:$0xff]  ;;  %v605_v10 = vld [vmem:[%s2087_s20 + $0x70] sm:$0xff] }
  0x97   : > { %944 = vmatpush.msrb.mxu3 %v861_v24  ;;  %1160 = vmatpush.msrb.mxu1 %v1051_v11  ;;  %v592_v24 = vld [vmem:[%s2087_s20 + $0x8] sm:$0xff] }
  0x98   : > { %v581_v11 = vld [vmem:[%s2356_s23 + $0xe0] sm:$0xff] }
  0x99   : > { %945 = vmatpush.msrb.mxu3 %v860_v29 }
  0x9a   : > { %708 = vmatmul.f32.gmra.mxu0 %v533_v31  ;;  %932 = vmatmul.f32.gmra.mxu3 %v585_v32 }
  0x9b   : > { %946 = vmatpush.msrb.mxu3 %v859_v33  ;;  %v564_v33 = vld [vmem:[%s2356_s23 + $0x58] sm:$0xff] }
  0x9c   : > { %782 = vmatmul.f32.gmra.mxu1 %v534_v35  ;;  %899 = vmatmul.f32.gmra.mxu2 %v563_v15  ;;  %v571_v35 = vld [vmem:[%s2356_s23 + $0x90] sm:$0xff] }
  0x9d   : > { %947 = vmatpush.msrb.mxu3 %v858_v36 }
  0x9f   : > { %948 = vmatpush.msrb.mxu3 %v857_v39 }
  0xa1   : > { %949 = vmatpush.msrb.mxu3 %v856_v43 }
  0xa2   : > { %711 = vmatmul.f32.gmra.mxu0 %v535_v45  ;;  %935 = vmatmul.f32.gmra.mxu3 %v587_v46 }
  0xa3   : > { %950 = vmatpush.msrb.mxu3 %v855_v47  ;;  %v568_v47 = vld [vmem:[%s2356_s23 + $0x78] sm:$0xff] }
  0xa4   : > { %785 = vmatmul.f32.gmra.mxu1 %v536_v49  ;;  %902 = vmatmul.f32.gmra.mxu2 %v565_v19  ;;  %v575_v49 = vld [vmem:[%s2356_s23 + $0xb0] sm:$0xff] }
  0xa5   : > { %951 = vmatpush.msrb.mxu3 %v854_v50  ;;  %v607_v19 = vld [vmem:[%s2087_s20 + $0x80] sm:$0xff] }
  0xa7   : > { %952 = vmatpush.msrb.mxu3 %v853_v53 }
  0xa9   : > { %953 = vmatpush.msrb.mxu3 %v852_v57 }
  0xaa   : > { %714 = vmatmul.f32.gmra.mxu0 %v537_v59  ;;  %938 = vmatmul.f32.gmra.mxu3 %v589_v60  ;;  %v2576_v59 = vld [vmem:[%s2898_s4] ss:$0 sm:$0xff] }
  0xab   : > { %954 = vmatpush.msrb.mxu3 %v851_v61 }
  0xac   : > { %788 = vmatmul.f32.gmra.mxu1 %v538_v63  ;;  %905 = vmatmul.f32.gmra.mxu2 %v567_v23 }
  0xad   : > { %955 = vmatpush.msrb.mxu3 %v850_v0  ;;  %v572_v0 = vld [vmem:[%s2356_s23 + $0x98] sm:$0xff] }
  0xaf   : > { %956 = vmatpush.msrb.mxu3 %v849_v3 }
  0xb1   : > { %957 = vmatpush.msrb.mxu3 %v848_v6 }
  0xb2   : > { %717 = vmatmul.f32.gmra.mxu0 %v539_v8  ;;  %958 = vmatmul.f32.vlgmr.msrb.gmra.mxu3 %v554_v9  ;;  %v574_v9 = vld [vmem:[%s2356_s23 + $0xa8] sm:$0xff] }
  0xb4   : > { %791 = vmatmul.f32.gmra.mxu1 %v540_v12  ;;  %908 = vmatmul.f32.gmra.mxu2 %v569_v28  ;;  %v610_v28 = vld [vmem:[%s2087_s20 + $0x98] sm:$0xff] }
  0xba   : > { %720 = vmatmul.f32.gmra.mxu0 %v541_v13  ;;  %961 = vmatmul.f32.gmra.mxu3 %v556_v14  ;;  %v606_v13 = vld [vmem:[%s2087_s20 + $0x78] sm:$0xff] }
  0xbc   : > { %794 = vmatmul.f32.gmra.mxu1 %v542_v16  ;;  %911 = vmatmul.f32.gmra.mxu2 %v571_v35  ;;  %v611_v35 = vld [vmem:[%s2087_s20 + $0xa0] sm:$0xff] }
  0xc2   : > { %723 = vmatmul.f32.gmra.mxu0 %v543_v17  ;;  %964 = vmatmul.f32.gmra.mxu3 %v558_v18  ;;  %v576_v18 = vld [vmem:[%s2356_s23 + $0xb8] sm:$0xff] }
  0xc4   : > { %797 = vmatmul.f32.gmra.mxu1 %v544_v20  ;;  %914 = vmatmul.f32.gmra.mxu2 %v573_v42  ;;  %v582_v42 = vld [vmem:[%s2356_s23 + $0xe8] sm:$0xff] }
  0xca   : > { %967 = vmatmul.f32.gmra.mxu3 %v560_v21  ;;  %1087 = vmatmul.f32.vlgmr.msrb.gmra.mxu0 %v591_v22  ;;  %v608_v21 = vld [vmem:[%s2087_s20 + $0x88] sm:$0xff] }
  0xcc   : > { %1161 = vmatmul.f32.vlgmr.msrb.gmra.mxu1 %v592_v24  ;;  %917 = vmatmul.f32.gmra.mxu2 %v575_v49  ;;  %v578_v24 = vld [vmem:[%s2356_s23 + $0xc8] sm:$0xff] }
  0xcf   : > { %v2531_v25 = vpop.f32.mrf.mxu0 }
  0xd1   : > { %v2536_v29 = vpop.f32.mrf.mxu1 }
  0xd2   : > { %970 = vmatmul.f32.gmra.mxu3 %v562_v26  ;;  %1090 = vmatmul.f32.gmra.mxu0 %v593_v27  ;;  %v609_v26 = vld [vmem:[%s2087_s20 + $0x90] sm:$0xff] }
  0xd4   : > { %1164 = vmatmul.f32.gmra.mxu1 %v594_v30  ;;  %920 = vmatmul.f32.gmra.mxu2 %v577_v56  ;;  %v1283_v30 = vld [vmem:[%s2903_s9 + $0x38] sm:$0xff] }
  0xd5   : > { %v727_v31 = vpop.f32.mrf.mxu3  ;;  %1354 = vmatpush.msrb.mxu2 %v1283_v30 }
  0xd6   : > { %v728_v60 = vadd.f32 %v2576_v59, %v727_v31 }
  0xd7   : > { %v2539_v32 = vpop.f32.mrf.mxu0 }
  0xd9   : > { %v2544_v36 = vpop.f32.mrf.mxu1 }
  0xda   : > { %973 = vmatmul.f32.gmra.mxu3 %v564_v33  ;;  %1093 = vmatmul.f32.gmra.mxu0 %v595_v34  ;;  %v580_v34 = vld [vmem:[%s2356_s23 + $0xd8] sm:$0xff] }
  0xdc   : > { %1167 = vmatmul.f32.gmra.mxu1 %v596_v37  ;;  %923 = vmatmul.f32.gmra.mxu2 %v579_v2  ;;  %v1279_v2 = vld [vmem:[%s2903_s9 + $0x18] sm:$0xff] }
  0xdd   : > { %v730_v38 = vpop.f32.mrf.mxu3 }
  0xde   : > { %v731_v5 = vadd.f32 %v2576_v59, %v730_v38  ;;  %v612_v38 = vld [vmem:[%s2087_s20 + $0xa8] sm:$0xff] }
  0xdf   : > { %v2547_v39 = vpop.f32.mrf.mxu0 }
  0xe1   : > { %v2552_v43 = vpop.f32.mrf.mxu1 }
  0xe2   : > { %976 = vmatmul.f32.gmra.mxu3 %v566_v40  ;;  %1096 = vmatmul.f32.gmra.mxu0 %v597_v41 }
  0xe4   : > { %1170 = vmatmul.f32.gmra.mxu1 %v598_v44  ;;  %926 = vmatmul.f32.gmra.mxu2 %v581_v11  ;;  %v613_v44 = vld [vmem:[%s2087_s20 + $0xb0] sm:$0xff] }
  0xe5   : > { %v733_v45 = vpop.f32.mrf.mxu3  ;;  %v1277_v11 = vld [vmem:[%s2903_s9 + $0x8] sm:$0xff] }
  0xe6   : > { %v734_v14 = vadd.f32 %v2576_v59, %v733_v45  ;;  %v885_v49 = vpop.f32.mrf.mxu2 }
  0xe7   : > { %v2555_v46 = vpop.f32.mrf.mxu0 }
  0xe9   : > { %v2560_v50 = vpop.f32.mrf.mxu1 }
  0xea   : > { %979 = vmatmul.f32.gmra.mxu3 %v568_v47  ;;  %1099 = vmatmul.f32.gmra.mxu0 %v599_v48  ;;  %v614_v48 = vld [vmem:[%s2087_s20 + $0xb8] sm:$0xff] }
  0xec   : > { %1173 = vmatmul.f32.gmra.mxu1 %v600_v51 }
  0xed   : > { %v2563_v52 = vpop.f32.mrf.mxu3 }
  0xef   : > { %v2565_v53 = vpop.f32.mrf.mxu0 }
  0xf1   : > { %v2570_v57 = vpop.f32.mrf.mxu1 }
  0xf2   : > { %982 = vmatmul.f32.gmra.mxu3 %v570_v54  ;;  %1102 = vmatmul.f32.gmra.mxu0 %v601_v55  ;;  %v1282_v54 = vld [vmem:[%s2903_s9 + $0x30] sm:$0xff]  ;;  %v1281_v55 = vld [vmem:[%s2903_s9 + $0x28] sm:$0xff] }
  0xf3   : > { %1355 = vmatpush.msrb.mxu2 %v1282_v54  ;;  %v2685_v54 = vld [vmem:[%s2900_s6] ss:$0 sm:$0xff] }
  0xf4   : > { %1176 = vmatmul.f32.gmra.mxu1 %v602_v58  ;;  %v1280_v58 = vld [vmem:[%s2903_s9 + $0x20] sm:$0xff] }
  0xf5   : > { %v801_v61 = vpop.f32.mrf.mxu3  ;;  %1356 = vmatpush.msrb.mxu2 %v1281_v55 }
  0xf6   : > { %v2579_v62 = vadd.f32 %v801_v61, %v728_v60  ;;  %v584_v61 = vld [vmem:[%s2356_s23 + $0xf8] sm:$0xff] }
  0xf7   : > { %v2581_v63 = vpop.f32.mrf.mxu0  ;;  %1357 = vmatpush.msrb.mxu2 %v1280_v58  ;;  %v590_v58 = vld [vmem:[%s2356_s23 + $0x128] sm:$0xff] }
  0xf9   : > { %v2586_v3 = vpop.f32.mrf.mxu1  ;;  %1358 = vmatpush.msrb.mxu2 %v1279_v2 }
  0xfa   : > { %985 = vmatmul.f32.gmra.mxu3 %v572_v0  ;;  %1105 = vmatmul.f32.gmra.mxu0 %v603_v1  ;;  %v615_v0 = vld [vmem:[%s2087_s20 + $0xc0] sm:$0xff] }
  0xfc   : > { %1179 = vmatmul.f32.gmra.mxu1 %v604_v4 }
  0xfd   : > { %v804_v6 = vpop.f32.mrf.mxu3 }
  0xfe   : > { %v2590_v7 = vadd.f32 %v804_v6, %v731_v5  ;;  %v616_v5 = vld [vmem:[%s2087_s20 + $0xc8] sm:$0xff] }
  0xff   : > { %v2592_v8 = vpop.f32.mrf.mxu0 }
 0x101   : > { %v2597_v12 = vpop.f32.mrf.mxu1 }
 0x102   : > { %988 = vmatmul.f32.gmra.mxu3 %v574_v9  ;;  %1108 = vmatmul.f32.gmra.mxu0 %v605_v10  ;;  %v1278_v9 = vld [vmem:[%s2903_s9 + $0x10] sm:$0xff]  ;;  %v888_v10 = vpop.f32.mrf.mxu2 }
 0x103   : > { %1359 = vmatpush.msrb.mxu2 %v1278_v9 }
 0x104   : > { %1182 = vmatmul.f32.gmra.mxu1 %v606_v13 }
 0x105   : > { %v807_v15 = vpop.f32.mrf.mxu3  ;;  %1360 = vmatpush.msrb.mxu2 %v1277_v11 }
 0x106   : > { %v2601_v16 = vadd.f32 %v807_v15, %v734_v14  ;;  %v1276_v14 = vld [vmem:[%s2903_s9] sm:$0xff] }
 0x107   : > { %v2603_v17 = vpop.f32.mrf.mxu0  ;;  %1361 = vmatpush.msrb.mxu2 %v1276_v14  ;;  %v2699_v14 = vld [vmem:[%s2902_s8] ss:$0 sm:$0xff] }
 0x109   : > { %v2607_v20 = vpop.f32.mrf.mxu1 }
 0x10a   : > { %991 = vmatmul.f32.gmra.mxu3 %v576_v18  ;;  %1111 = vmatmul.f32.gmra.mxu0 %v607_v19  ;;  %v586_v18 = vld [vmem:[%s2356_s23 + $0x108] sm:$0xff] }
 0x10b   : > { %v617_v19 = vld [vmem:[%s2087_s20 + $0xd0] sm:$0xff] }
 0x10c   : > { %1185 = vmatmul.f32.gmra.mxu1 %v608_v21 }
 0x10d   : > { %v2610_v22 = vpop.f32.mrf.mxu3 }
 0x10f   : > { %v2612_v23 = vpop.f32.mrf.mxu0 }
 0x111   : > { %v2616_v27 = vpop.f32.mrf.mxu1 }
 0x112   : > { %994 = vmatmul.f32.gmra.mxu3 %v578_v24  ;;  %1114 = vmatmul.f32.gmra.mxu0 %v609_v26  ;;  %v618_v26 = vld [vmem:[%s2087_s20 + $0xd8] sm:$0xff] }
 0x114   : > { %1188 = vmatmul.f32.gmra.mxu1 %v610_v28 }
 0x115   : > { %v2622_v31 = vpop.f32.mrf.mxu3 }
 0x117   : > { %v2624_v33 = vpop.f32.mrf.mxu0 }
 0x119   : > { %v2628_v37 = vpop.f32.mrf.mxu1 }
 0x11a   : > { %997 = vmatmul.f32.gmra.mxu3 %v580_v34  ;;  %1117 = vmatmul.f32.gmra.mxu0 %v611_v35  ;;  %v891_v34 = vpop.f32.mrf.mxu2 }
 0x11c   : > { %1191 = vmatmul.f32.gmra.mxu1 %v612_v38  ;;  %v588_v38 = vld [vmem:[%s2356_s23 + $0x118] sm:$0xff]  ;;  %s1574_s23 = sshll.u32 %s1570_s25, 4  ;;  %s1575_s23 = int_to_ptr.hbm [resolvable:$true] %s1574_s23 }
 0x11d   : > { %v2631_v40 = vpop.f32.mrf.mxu3  ;;  %s1877_s27 = sshra.s32 %s1575_s23, 4  ;;  %s1878_s27 = int_to_ptr.hbm [resolvable:$true] %s1877_s27 }
 0x11e   : > { %p1884_p4 = scmp.lt.s32.totalorder %s1878_s27, %s2927_s14 }
 0x11f   : > { %v712_v41 = vpop.f32.mrf.mxu0 }
 0x120   : > { %v713_v45 = vadd.f32 %v2576_v59, %v712_v41  ;;  %v619_v41 = vld [vmem:[%s2087_s20 + $0xe0] sm:$0xff] }
 0x121   : > { %v786_v47 = vpop.f32.mrf.mxu1 }
 0x122   : > { %v2637_v51 = vadd.f32 %v786_v47, %v713_v45  ;;  %1000 = vmatmul.f32.gmra.mxu3 %v582_v42  ;;  %1120 = vmatmul.f32.gmra.mxu0 %v613_v44  ;;  %v620_v45 = vld [vmem:[%s2087_s20 + $0xe8] sm:$0xff] }
 0x124   : > { %1194 = vmatmul.f32.gmra.mxu1 %v614_v48 }
 0x125   : > { %v2645_v56 = vpop.f32.mrf.mxu3 }
 0x127   : > { %v715_v60 = vpop.f32.mrf.mxu0 }
 0x128   : > { %v716_v1 = vadd.f32 %v2576_v59, %v715_v60  ;;  %v621_v60 = vld [vmem:[%s2087_s20 + $0xf0] sm:$0xff] }
 0x129   : > { %v789_v4 = vpop.f32.mrf.mxu1 }
 0x12a   : > { %v2657_v6 = vadd.f32 %v789_v4, %v716_v1  ;;  %1003 = vmatmul.f32.gmra.mxu3 %v584_v61  ;;  %1123 = vmatmul.f32.gmra.mxu0 %v615_v0  ;;  %v894_v61 = vpop.f32.mrf.mxu2  ;;  %v886_v0 = vadd.f32 %v2685_v54, %v885_v49  ;;  %v622_v4 = vld [vmem:[%s2087_s20 + $0xf8] sm:$0xff] }
 0x12c   : > { %1197 = vmatmul.f32.gmra.mxu1 %v616_v5  ;;  %v683_v5 = vadd.f32 %v2576_v59, %v2531_v25 }
 0x12d   : > { %v2665_v13 = vpop.f32.mrf.mxu3 }
 0x12f   : > { %v718_v15 = vpop.f32.mrf.mxu0 }
 0x130   : > { %v719_v21 = vadd.f32 %v2576_v59, %v718_v15  ;;  %v757_v15 = vadd.f32 %v2536_v29, %v683_v5  ;;  %v626_v5 = vld [vmem:[%s2087_s20 + $0x118] sm:$0xff] }
 0x131   : > { %v792_v24 = vpop.f32.mrf.mxu1 }
 0x132   : > { %v2674_v28 = vadd.f32 %v792_v24, %v719_v21  ;;  %1006 = vmatmul.f32.gmra.mxu3 %v586_v18  ;;  %1126 = vmatmul.f32.gmra.mxu0 %v617_v19  ;;  %v623_v19 = vld [vmem:[%s2087_s20 + $0x100] sm:$0xff]  ;;  %v889_v24 = vadd.f32 %v2685_v54, %v888_v10 }
 0x134   : > { %1200 = vmatmul.f32.gmra.mxu1 %v618_v26 }
 0x135   : > { %v959_v30 = vpop.f32.mrf.mxu3 }
 0x136   : > { %v960_v11 = vadd.f32 %v959_v30, %v886_v0  ;;  %v897_v30 = vpop.f32.mrf.mxu2  ;;  %v625_v0 = vld [vmem:[%s2087_s20 + $0x110] sm:$0xff] }
 0x137   : > { %v721_v35 = vpop.f32.mrf.mxu0 }
 0x138   : > { %v722_v42 = vadd.f32 %v2576_v59, %v721_v35  ;;  %v1016_v21 = vmax.f32 %v960_v11, 0.0  ;;  %v624_v35 = vld [vmem:[%s2087_s20 + $0x108] sm:$0xff]  ;;  %v689_v11 = vadd.f32 %v2576_v59, %v2547_v39 }
 0x139   : > { %v795_v44 = vpop.f32.mrf.mxu1 }
 0x13a   : > { %v2680_v47 = vadd.f32 %v795_v44, %v722_v42  ;;  %1009 = vmatmul.f32.gmra.mxu3 %v588_v38  ;;  %1129 = vmatmul.f32.gmra.mxu0 %v619_v41  ;;  %v813_v38 = vmax.f32 %v757_v15, 0.0  ;;  %v686_v41 = vadd.f32 %v2576_v59, %v2539_v32 }
 0x13c   : > { %1203 = vmatmul.f32.gmra.mxu1 %v620_v45  ;;  %v1238_v44 = vadd.f32 %v1016_v21, %v813_v38  ;;  %v760_v10 = vadd.f32 %v2544_v36, %v686_v41  ;;  %v895_v41 = vadd.f32 %v2685_v54, %v894_v61 }
 0x13d   : > { %v962_v48 = vpop.f32.mrf.mxu3 }
 0x13e   : > { %v963_v29 = vadd.f32 %v962_v48, %v889_v24  ;;  %v814_v48 = vmax.f32 %v760_v10, 0.0  ;;  %v900_v36 = vpop.f32.mrf.mxu2  ;;  %v763_v24 = vadd.f32 %v2552_v43, %v689_v11 }
 0x13f   : > { %v724_v55 = vpop.f32.mrf.mxu0 }
 0x140   : > { %v725_v1 = vadd.f32 %v2576_v59, %v724_v55 }
 0x141   : > { %v798_v2 = vpop.f32.mrf.mxu1 }
 0x142   : > { %v2694_v9 = vadd.f32 %v798_v2, %v725_v1  ;;  %1012 = vmatmul.f32.gmra.mxu3 %v590_v58  ;;  %1132 = vmatmul.f32.gmra.mxu0 %v621_v60  ;;  %v1017_v1 = vmax.f32 %v963_v29, 0.0  ;;  %v892_v2 = vadd.f32 %v2685_v54, %v891_v34  ;;  %v815_v29 = vmax.f32 %v763_v24, 0.0 }
 0x144   : > { %1206 = vmatmul.f32.gmra.mxu1 %v622_v4 }
 0x145   : > { %v965_v49 = vpop.f32.mrf.mxu3 }
 0x147   : > { %v1088_v18 = vpop.f32.mrf.mxu0 }
 0x148   : > { %v1089_v25 = vadd.f32 %v2699_v14, %v1088_v18  ;;  %v1239_v18 = vadd.f32 %v1017_v1, %v814_v48 }
 0x149   : > { %v1162_v26 = vpop.f32.mrf.mxu1 }
 0x14a   : > { %v1163_v42 = vadd.f32 %v1162_v26, %v1089_v25  ;;  %1135 = vmatmul.f32.gmra.mxu0 %v623_v19  ;;  %v966_v19 = vadd.f32 %v965_v49, %v892_v2  ;;  %v692_v49 = vadd.f32 %v2576_v59, %v2555_v46 }
 0x14c   : > { %v1219_v45 = vmax.f32 %v1163_v42, 0.0  ;;  %1209 = vmatmul.f32.gmra.mxu1 %v624_v35  ;;  %v627_v35 = vld [vmem:[%s2087_s20 + $0x120] sm:$0xff]  ;;  %v1018_v38 = vmax.f32 %v966_v19, 0.0  ;;  %v766_v61 = vadd.f32 %v2560_v50, %v692_v49 }
 0x14d   : > { %v968_v55 = vpop.f32.mrf.mxu3 }
 0x14e   : > { %v1257_v58 = vadd.f32 %v1238_v44, %v1219_v45  ;;  %v628_v44 = vld [vmem:[%s2087_s20 + $0x128] sm:$0xff]  ;;  %v1240_v10 = vadd.f32 %v1018_v38, %v815_v29  ;;  %v969_v43 = vadd.f32 %v968_v55, %v895_v41  ;;  %v816_v48 = vmax.f32 %v766_v61, 0.0  ;;  %s1879_s20 = scalar_lea.hbm %s1878_s27, 2 }
 0x14f   : > { %v1091_v60 = vpop.f32.mrf.mxu0  ;;  %v695_v55 = vadd.f32 %v2576_v59, %v2565_v53  ;;  %v698_v53 = vadd.f32 %v2576_v59, %v2581_v63  ;;  %v701_v63 = vadd.f32 %v2576_v59, %v2592_v8  ;;  %v704_v8 = vadd.f32 %v2576_v59, %v2603_v17  ;;  %p1880_p13 = scmp.ne.s32.totalorder %s1878_s27, %s1879_s20  ;;  %p1885_p5 = scmp.lt.s32.totalorder %s1883_s15, %s1879_s20 }
 0x150   : > { %v1092_v4 = vadd.f32 %v2699_v14, %v1091_v60  ;;  %1680 = vmatmul.msk.f32.vlgmr.msrb.gmra.mxu2 %vm1288_vm0, %v1257_v58  ;;  %v707_v17 = vadd.f32 %v2576_v59, %v2612_v23  ;;  %v710_v23 = vadd.f32 %v2576_v59, %v2624_v33 }
 0x151   : > { %v1165_v32 = vpop.f32.mrf.mxu1  ;;  %v769_v50 = vadd.f32 %v2570_v57, %v695_v55  ;;  %v772_v49 = vadd.f32 %v2586_v3, %v698_v53  ;;  %p1881_p2 = pnand %p1880_p13, %p2053_p11  ;;  %p1886_p7 = por %p1885_p5, %p1884_p4 }
 0x152   : > { %v1166_v15 = vadd.f32 %v1165_v32, %v1092_v4  ;;  %1138 = vmatmul.f32.gmra.mxu0 %v625_v0  ;;  %v903_v0 = vpop.f32.mrf.mxu2  ;;  %v1019_v4 = vmax.f32 %v969_v43, 0.0  ;;  %v898_v32 = vadd.f32 %v2685_v54, %v897_v30 }
 0x153   : > { %p1882_p3 = pneg %p1881_p2 }
 0x154   : > { %v1220_v21 = vmax.f32 %v1166_v15, 0.0  ;;  %1212 = vmatmul.f32.gmra.mxu1 %v626_v5  ;;  %v1241_v15 = vadd.f32 %v1019_v4, %v816_v48 }
 0x155   : > { %v971_v34 = vpop.f32.mrf.mxu3  ;;  %p1887_p8 = pnand %p1886_p7, %p1882_p3 }
 0x156   : > { %v1258_v25 = vadd.f32 %v1239_v18, %v1220_v21  ;;  %v972_v18 = vadd.f32 %v971_v34, %v898_v32 }
 0x157   : > { %v1094_v26 = vpop.f32.mrf.mxu0 }
 0x158   : > { %v1095_v42 = vadd.f32 %v2699_v14, %v1094_v26  ;;  %1681 = vmatmul.msk.f32.gmra.mxu2 %vm1288_vm0, %v1258_v25  ;;  %v1020_v30 = vmax.f32 %v972_v18, 0.0 }
 0x159   : > { %v1168_v39 = vpop.f32.mrf.mxu1 }
 0x15a   : > { %v1169_v45 = vadd.f32 %v1168_v39, %v1095_v42  ;;  %1141 = vmatmul.f32.gmra.mxu0 %v627_v35  ;;  %v906_v26 = vpop.f32.mrf.mxu2  ;;  %v901_v35 = vadd.f32 %v2685_v54, %v900_v36  ;;  %v817_v42 = vmax.f32 %v769_v50, 0.0  ;;  %v904_v36 = vadd.f32 %v2685_v54, %v903_v0 }
 0x15c   : > { %v1221_v58 = vmax.f32 %v1169_v45, 0.0  ;;  %1215 = vmatmul.f32.gmra.mxu1 %v628_v44  ;;  %v1242_v39 = vadd.f32 %v1020_v30, %v817_v42 }
 0x15d   : > { %v974_v60 = vpop.f32.mrf.mxu3 }
 0x15e   : > { %v1259_v1 = vadd.f32 %v1240_v10, %v1221_v58  ;;  %v975_v44 = vadd.f32 %v974_v60, %v901_v35  ;;  %v778_v35 = vadd.f32 %v2607_v20, %v704_v8 }
 0x15f   : > { %v1097_v2 = vpop.f32.mrf.mxu0 }
 0x160   : > { %v1098_v5 = vadd.f32 %v2699_v14, %v1097_v2  ;;  %1682 = vmatmul.msk.f32.gmra.mxu2 %vm1288_vm0, %v1259_v1  ;;  %v1021_v43 = vmax.f32 %v975_v44, 0.0  ;;  %v818_v2 = vmax.f32 %v772_v49, 0.0 }
 0x161   : > { %v1171_v46 = vpop.f32.mrf.mxu1 }
 0x162   : > { %v1172_v11 = vadd.f32 %v1171_v46, %v1098_v5  ;;  %v909_v1 = vpop.f32.mrf.mxu2  ;;  %v1243_v4 = vadd.f32 %v1021_v43, %v818_v2  ;;  %v775_v46 = vadd.f32 %v2597_v12, %v701_v63 }
 0x163   : > { %v910_v42 = vadd.f32 %v2685_v54, %v909_v1 }
 0x164   : > { %v1222_v19 = vmax.f32 %v1172_v11, 0.0  ;;  %v907_v11 = vadd.f32 %v2685_v54, %v906_v26 }
 0x165   : > { %v977_v21 = vpop.f32.mrf.mxu3 }
 0x166   : > { %v1260_v24 = vadd.f32 %v1241_v15, %v1222_v19  ;;  %v978_v32 = vadd.f32 %v977_v21, %v904_v36  ;;  %v819_v19 = vmax.f32 %v775_v46, 0.0 }
 0x167   : > { %v1100_v25 = vpop.f32.mrf.mxu0 }
 0x168   : > { %v1101_v38 = vadd.f32 %v2699_v14, %v1100_v25  ;;  %1683 = vmatmul.msk.f32.gmra.mxu2 %vm1288_vm0, %v1260_v24  ;;  %v1022_v0 = vmax.f32 %v978_v32, 0.0 }
 0x169   : > { %v1174_v41 = vpop.f32.mrf.mxu1 }
 0x16a   : > { %v1175_v34 = vadd.f32 %v1174_v41, %v1101_v38  ;;  %v912_v21 = vpop.f32.mrf.mxu2  ;;  %v1244_v24 = vadd.f32 %v1022_v0, %v819_v19 }
 0x16c   : > { %v1223_v29 = vmax.f32 %v1175_v34, 0.0 }
 0x16d   : > { %v980_v57 = vpop.f32.mrf.mxu3 }
 0x16e   : > { %v1261_v45 = vadd.f32 %v1242_v39, %v1223_v29  ;;  %v981_v25 = vadd.f32 %v980_v57, %v907_v11  ;;  %v820_v39 = vmax.f32 %v778_v35, 0.0 }
 0x16f   : > { %v1103_v10 = vpop.f32.mrf.mxu0 }
 0x170   : > { %v1104_v58 = vadd.f32 %v2699_v14, %v1103_v10  ;;  %1684 = vmatmul.msk.f32.gmra.mxu2 %vm1288_vm0, %v1261_v45  ;;  %v1023_v26 = vmax.f32 %v981_v25, 0.0  ;;  %v781_v10 = vadd.f32 %v2616_v27, %v707_v17  ;;  %v784_v27 = vadd.f32 %v2628_v37, %v710_v23 }
 0x171   : > { %v1177_v61 = vpop.f32.mrf.mxu1 }
 0x172   : > { %v1178_v60 = vadd.f32 %v1177_v61, %v1104_v58  ;;  %v1245_v29 = vadd.f32 %v1023_v26, %v820_v39  ;;  %v915_v45 = vpop.f32.mrf.mxu2  ;;  %v913_v61 = vadd.f32 %v2685_v54, %v912_v21  ;;  %v821_v63 = vmax.f32 %v781_v10, 0.0 }
 0x173   : > { %v916_v11 = vadd.f32 %v2685_v54, %v915_v45  ;;  %v822_v19 = vmax.f32 %v784_v27, 0.0  ;;  %v823_v26 = vmax.f32 %v2637_v51, 0.0  ;;  %v824_v10 = vmax.f32 %v2657_v6, 0.0 }
 0x174   : > { %v1224_v5 = vmax.f32 %v1178_v60, 0.0 }
 0x175   : > { %v983_v3 = vpop.f32.mrf.mxu3 }
 0x176   : > { %v1262_v48 = vadd.f32 %v1243_v4, %v1224_v5  ;;  %v984_v57 = vadd.f32 %v983_v3, %v910_v42 }
 0x177   : > { %v1106_v55 = vpop.f32.mrf.mxu0 }
 0x178   : > { %v1107_v15 = vadd.f32 %v2699_v14, %v1106_v55  ;;  %1685 = vmatmul.msk.f32.gmra.mxu2 %vm1288_vm0, %v1262_v48  ;;  %v1024_v58 = vmax.f32 %v984_v57, 0.0 }
 0x179   : > { %v1180_v18 = vpop.f32.mrf.mxu1 }
 0x17a   : > { %v1181_v50 = vadd.f32 %v1180_v18, %v1107_v15  ;;  %v1246_v4 = vadd.f32 %v1024_v58, %v821_v63  ;;  %v918_v48 = vpop.f32.mrf.mxu2 }
 0x17c   : > { %v1225_v30 = vmax.f32 %v1181_v50, 0.0 }
 0x17d   : > { %v986_v12 = vpop.f32.mrf.mxu3 }
 0x17e   : > { %v1263_v38 = vadd.f32 %v1244_v24, %v1225_v30  ;;  %v987_v32 = vadd.f32 %v986_v12, %v913_v61  ;;  %v919_v12 = vadd.f32 %v2685_v54, %v918_v48 }
 0x17f   : > { %v1109_v41 = vpop.f32.mrf.mxu0 }
 0x180   : > { %v1110_v53 = vadd.f32 %v2699_v14, %v1109_v41  ;;  %1686 = vmatmul.msk.f32.gmra.mxu2 %vm1288_vm0, %v1263_v38  ;;  %v1025_v0 = vmax.f32 %v987_v32, 0.0 }
 0x181   : > { %v1183_v34 = vpop.f32.mrf.mxu1 }
 0x182   : > { %v1184_v44 = vadd.f32 %v1183_v34, %v1110_v53  ;;  %v1247_v8 = vadd.f32 %v1025_v0, %v822_v19  ;;  %v921_v38 = vpop.f32.mrf.mxu2 }
 0x184   : > { %v1226_v49 = vmax.f32 %v1184_v44, 0.0 }
 0x185   : > { %v989_v20 = vpop.f32.mrf.mxu3 }
 0x186   : > { %v1264_v43 = vadd.f32 %v1245_v29, %v1226_v49  ;;  %v990_v50 = vadd.f32 %v989_v20, %v916_v11  ;;  %v922_v49 = vadd.f32 %v2685_v54, %v921_v38  ;;  %v829_v38 = vmax.f32 %v2590_v7, 0.0 }
 0x187   : > { %v1112_v36 = vpop.f32.mrf.mxu0 }
 0x188   : > { %v1113_v1 = vadd.f32 %v2699_v14, %v1112_v36  ;;  %1687 = vmatmul.msk.f32.gmra.mxu2 %vm1288_vm0, %v1264_v43  ;;  %v1026_v37 = vmax.f32 %v990_v50, 0.0 }
 0x189   : > { %v1186_v2 = vpop.f32.mrf.mxu1 }
 0x18a   : > { %v1187_v60 = vadd.f32 %v1186_v2, %v1113_v1  ;;  %v1248_v53 = vadd.f32 %v1026_v37, %v823_v26  ;;  %v924_v36 = vpop.f32.mrf.mxu2 }
 0x18c   : > { %v1227_v5 = vmax.f32 %v1187_v60, 0.0  ;;  %v925_v60 = vadd.f32 %v2685_v54, %v924_v36 }
 0x18d   : > { %v992_v3 = vpop.f32.mrf.mxu3 }
 0x18e   : > { %v1265_v46 = vadd.f32 %v1246_v4, %v1227_v5  ;;  %v993_v34 = vadd.f32 %v992_v3, %v919_v12  ;;  %v825_v5 = vmax.f32 %v2674_v28, 0.0  ;;  %v934_v28 = vadd.f32 %v2685_v54, %v2631_v40 }
 0x18f   : > { %v1115_v55 = vpop.f32.mrf.mxu0  ;;  %v827_v40 = vmax.f32 %v2694_v9, 0.0 }
 0x190   : > { %v1116_v15 = vadd.f32 %v2699_v14, %v1115_v55  ;;  %1688 = vmatmul.msk.f32.gmra.mxu2 %vm1288_vm0, %v1265_v46  ;;  %v1027_v57 = vmax.f32 %v993_v34, 0.0 }
 0x191   : > { %v1189_v18 = vpop.f32.mrf.mxu1 }
 0x192   : > { %v1190_v33 = vadd.f32 %v1189_v18, %v1116_v15  ;;  %v1249_v51 = vadd.f32 %v1027_v57, %v824_v10  ;;  %v927_v48 = vpop.f32.mrf.mxu2  ;;  %v830_v10 = vmax.f32 %v2601_v16, 0.0 }
 0x193   : > { %v928_v18 = vadd.f32 %v2685_v54, %v927_v48 }
 0x194   : > { %v1228_v21 = vmax.f32 %v1190_v33, 0.0 }
 0x195   : > { %v995_v24 = vpop.f32.mrf.mxu3 }
 0x196   : > { %v1266_v25 = vadd.f32 %v1247_v8, %v1228_v21  ;;  %v996_v58 = vadd.f32 %v995_v24, %v922_v49  ;;  %v826_v8 = vmax.f32 %v2680_v47, 0.0 }
 0x197   : > { %v1118_v30 = vpop.f32.mrf.mxu0 }
 0x198   : > { %v1119_v35 = vadd.f32 %v2699_v14, %v1118_v30  ;;  %1689 = vmatmul.msk.f32.gmra.mxu2 %vm1288_vm0, %v1266_v25  ;;  %v1028_v23 = vmax.f32 %v996_v58, 0.0 }
 0x199   : > { %v1192_v41 = vpop.f32.mrf.mxu1 }
 0x19a   : > { %v1193_v42 = vadd.f32 %v1192_v41, %v1119_v35  ;;  %v1250_v6 = vadd.f32 %v1028_v23, %v825_v5 }
 0x19c   : > { %v1229_v39 = vmax.f32 %v1193_v42, 0.0 }
 0x19d   : > { %v998_v17 = vpop.f32.mrf.mxu3 }
 0x19e   : > { %v1267_v44 = vadd.f32 %v1248_v53, %v1229_v39  ;;  %v999_v27 = vadd.f32 %v998_v17, %v925_v60  ;;  %v931_v53 = vadd.f32 %v2685_v54, %v2622_v31  ;;  %v937_v17 = vadd.f32 %v2685_v54, %v2645_v56 }
 0x19f   : > { %v1121_v29 = vpop.f32.mrf.mxu0  ;;  %v828_v56 = vmax.f32 %v2579_v62, 0.0 }
 0x1a0   : > { %v1122_v45 = vadd.f32 %v2699_v14, %v1121_v29  ;;  %1690 = vmatmul.msk.f32.gmra.mxu2 %vm1288_vm0, %v1267_v44  ;;  %v1029_v15 = vmax.f32 %v999_v27, 0.0 }
 0x1a1   : > { %v1195_v20 = vpop.f32.mrf.mxu1 }
 0x1a2   : > { %v1196_v43 = vadd.f32 %v1195_v20, %v1122_v45  ;;  %v1251_v21 = vadd.f32 %v1029_v15, %v826_v8 }
 0x1a4   : > { %v1230_v61 = vmax.f32 %v1196_v43, 0.0 }
 0x1a5   : > { %v1001_v1 = vpop.f32.mrf.mxu3 }
 0x1a6   : > { %v1268_v2 = vadd.f32 %v1249_v51, %v1230_v61  ;;  %v1002_v24 = vadd.f32 %v1001_v1, %v928_v18  ;;  %v737_v51 = vadd.f32 %v2576_v59, %v2563_v52 }
 0x1a7   : > { %v1124_v63 = vpop.f32.mrf.mxu0 }
 0x1a8   : > { %v1125_v4 = vadd.f32 %v2699_v14, %v1124_v63  ;;  %1691 = vmatmul.msk.f32.gmra.mxu2 %vm1288_vm0, %v1268_v2  ;;  %v1030_v41 = vmax.f32 %v1002_v24, 0.0  ;;  %v811_v1 = vadd.f32 %v2610_v22, %v737_v51  ;;  %v940_v2 = vadd.f32 %v2685_v54, %v2665_v13 }
 0x1a9   : > { %v1198_v32 = vpop.f32.mrf.mxu1 }
 0x1aa   : > { %v1199_v3 = vadd.f32 %v1198_v32, %v1125_v4  ;;  %v1252_v44 = vadd.f32 %v1030_v41, %v827_v40  ;;  %v831_v5 = vmax.f32 %v811_v1, 0.0 }
 0x1ac   : > { %v1231_v46 = vmax.f32 %v1199_v3, 0.0 }
 0x1ad   : > { %v1004_v55 = vpop.f32.mrf.mxu3 }
 0x1ae   : > { %v1269_v0 = vadd.f32 %v1250_v6, %v1231_v46  ;;  %v1005_v29 = vadd.f32 %v1004_v55, %v931_v53  ;;  %v2813_v53 = vld [vmem:[%s2904_s10] ss:$0 sm:$0xff] }
 0x1af   : > { %v1127_v11 = vpop.f32.mrf.mxu0 }
 0x1b0   : > { %v1128_v19 = vadd.f32 %v2699_v14, %v1127_v11  ;;  %1692 = vmatmul.msk.f32.gmra.mxu2 %vm1288_vm0, %v1269_v0  ;;  %v1031_v43 = vmax.f32 %v1005_v29, 0.0 }
 0x1b1   : > { %v1201_v33 = vpop.f32.mrf.mxu1 }
 0x1b2   : > { %v1202_v50 = vadd.f32 %v1201_v33, %v1128_v19  ;;  %v1253_v16 = vadd.f32 %v1031_v43, %v828_v56 }
 0x1b4   : > { %v1232_v25 = vmax.f32 %v1202_v50, 0.0 }
 0x1b5   : > { %v1007_v30 = vpop.f32.mrf.mxu3 }
 0x1b6   : > { %v1270_v37 = vadd.f32 %v1251_v21, %v1232_v25  ;;  %v1008_v12 = vadd.f32 %v1007_v30, %v934_v28 }
 0x1b7   : > { %v1130_v35 = vpop.f32.mrf.mxu0 }
 0x1b8   : > { %v1032_v26 = vmax.f32 %v1008_v12, 0.0  ;;  %v1131_v42 = vadd.f32 %v2699_v14, %v1130_v35  ;;  %1693 = vmatmul.msk.f32.gmra.mxu2 %vm1288_vm0, %v1270_v37 }
 0x1b9   : > { %v1204_v47 = vpop.f32.mrf.mxu1 }
 0x1ba   : > { %v1254_v34 = vadd.f32 %v1032_v26, %v829_v38  ;;  %v1205_v39 = vadd.f32 %v1204_v47, %v1131_v42 }
 0x1bc   : > { %v1233_v7 = vmax.f32 %v1205_v39, 0.0 }
 0x1bd   : > { %v1010_v57 = vpop.f32.mrf.mxu3 }
 0x1be   : > { %v1271_v49 = vadd.f32 %v1252_v44, %v1233_v7  ;;  %v1011_v45 = vadd.f32 %v1010_v57, %v937_v17 }
 0x1bf   : > { %v1133_v20 = vpop.f32.mrf.mxu0 }
 0x1c0   : > { %v1033_v36 = vmax.f32 %v1011_v45, 0.0  ;;  %v1134_v31 = vadd.f32 %v2699_v14, %v1133_v20  ;;  %1694 = vmatmul.msk.f32.gmra.mxu2 %vm1288_vm0, %v1271_v49 }
 0x1c1   : > { %v1207_v9 = vpop.f32.mrf.mxu1 }
 0x1c2   : > { %v1255_v58 = vadd.f32 %v1033_v36, %v830_v10  ;;  %v1208_v61 = vadd.f32 %v1207_v9, %v1134_v31 }
 0x1c4   : > { %v1234_v63 = vmax.f32 %v1208_v61, 0.0 }
 0x1c5   : > { %v1013_v23 = vpop.f32.mrf.mxu3 }
 0x1c6   : > { %v1272_v60 = vadd.f32 %v1253_v16, %v1234_v63  ;;  %v1014_v4 = vadd.f32 %v1013_v23, %v940_v2 }
 0x1c7   : > { %v1136_v32 = vpop.f32.mrf.mxu0 }
 0x1c8   : > { %v1034_v3 = vmax.f32 %v1014_v4, 0.0  ;;  %v1137_v6 = vadd.f32 %v2699_v14, %v1136_v32  ;;  %1695 = vmatmul.msk.f32.gmra.mxu2 %vm1288_vm0, %v1272_v60  ;;  %v1440_v60 = vld [vmem:[#allocation2] sm:$0x1]  ;;  %v1933_v4 = vmov 0  }
 0x1c9   : > { %v1210_v52 = vpop.f32.mrf.mxu1  ;;  %1828 = vset.pattern.permute.xlu0 %v1933_v4 }
 0x1ca   : > { %v1256_v59 = vadd.f32 %v1034_v3, %v831_v5  ;;  %v1211_v62 = vadd.f32 %v1210_v52, %v1137_v6  ;;  %1443 = vperm.xlu0 %1828, %v1440_v60  }
 0x1cc   : > { %v1235_v27 = vmax.f32 %v1211_v62, 0.0 }
 0x1ce   : > { %v1273_v22 = vadd.f32 %v1254_v34, %v1235_v27 }
 0x1cf   : > { %v1139_v46 = vpop.f32.mrf.mxu0 }
 0x1d0   : > { %v1140_v13 = vadd.f32 %v2699_v14, %v1139_v46  ;;  %1696 = vmatmul.msk.f32.gmra.mxu2 %vm1288_vm0, %v1273_v22 }
 0x1d1   : > { %v1213_v54 = vpop.f32.mrf.mxu1 }
 0x1d2   : > { %v1214_v48 = vadd.f32 %v1213_v54, %v1140_v13 }
 0x1d3   : > { %v2803_v55 = vpop.f32.mrf.mxu2 }
 0x1d4   : > { %v1236_v0 = vmax.f32 %v1214_v48, 0.0  ;;  %v1364_v22 = vadd.f32 %v2813_v53, %v2803_v55 }
 0x1d6   : > { %v1274_v11 = vadd.f32 %v1255_v58, %v1236_v0  ;;  %v1420_v54 = vmax.f32 %v1364_v22, 0.0 }
 0x1d7   : > { %v1142_v15 = vpop.f32.mrf.mxu0 }
 0x1d8   : > { %v1143_v18 = vadd.f32 %v2699_v14, %v1142_v15  ;;  %1697 = vmatmul.msk.f32.gmra.mxu2 %vm1288_vm0, %v1274_v11  ;;  %v1439_v11 = vld [vmem:[%s2905_s11] sm:$0x1] }
 0x1d9   : > { %v1216_v19 = vpop.f32.mrf.mxu1 }
 0x1da   : > { %v1217_v33 = vadd.f32 %v1216_v19, %v1143_v18 }
 0x1db   : > { %v2807_v8 = vpop.f32.mrf.mxu2 }
 0x1dc   : > { %v1237_v50 = vmax.f32 %v1217_v33, 0.0 }
 0x1de   : > { %v1275_v28 = vadd.f32 %v1256_v59, %v1237_v50  ;;  %v1367_v59 = vadd.f32 %v2813_v53, %v2807_v8  ;;  %v1554_v50 = vlaneseq }
 0x1e0   : > { %1698 = vmatmul.msk.f32.gmra.mxu2 %vm1288_vm0, %v1275_v28  ;;  %v1421_v46 = vmax.f32 %v1367_v59, 0.0  ;;  %vm1556_vm3 = vcmp.lt.s32.totalorder %v1554_v50, 152 }
 0x1e3   : > { %v1369_v21 = vpop.f32.mrf.mxu2 }
 0x1e4   : > { %v1370_v6 = vadd.f32 %v2813_v53, %v1369_v21 }
 0x1e6   : > { %v1422_v62 = vmax.f32 %v1370_v6, 0.0 }
 0x1eb   : > { %v1372_v24 = vpop.f32.mrf.mxu2 }
 0x1ec   : > { %v1373_v32 = vadd.f32 %v2813_v53, %v1372_v24 }
 0x1ee   : > { %v1423_v52 = vmax.f32 %v1373_v32, 0.0 }
 0x1f3   : > { %v1375_v25 = vpop.f32.mrf.mxu2 }
 0x1f4   : > { %v1376_v63 = vadd.f32 %v2813_v53, %v1375_v25 }
 0x1f6   : > { %v1424_v5 = vmax.f32 %v1376_v63, 0.0 }
 0x1fb   : > { %v1378_v30 = vpop.f32.mrf.mxu2 }
 0x1fc   : > { %v1379_v2 = vadd.f32 %v2813_v53, %v1378_v30 }
 0x1fe   : > { %v1425_v23 = vmax.f32 %v1379_v2, 0.0 }
 0x203   : > { %v1381_v37 = vpop.f32.mrf.mxu2 }
 0x204   : > { %v1382_v58 = vadd.f32 %v2813_v53, %v1381_v37 }
 0x206   : > { %v1426_v16 = vmax.f32 %v1382_v58, 0.0 }
 0x20b   : > { %v1384_v12 = vpop.f32.mrf.mxu2 }
 0x20c   : > { %v1385_v51 = vadd.f32 %v2813_v53, %v1384_v12 }
 0x20e   : > { %v1427_v61 = vmax.f32 %v1385_v51, 0.0 }
 0x213   : > { %v1387_v35 = vpop.f32.mrf.mxu2 }
 0x214   : > { %v1388_v31 = vadd.f32 %v2813_v53, %v1387_v35 }
 0x216   : > { %v1428_v56 = vmax.f32 %v1388_v31, 0.0 }
 0x21b   : > { %v1390_v38 = vpop.f32.mrf.mxu2 }
 0x21c   : > { %v1391_v43 = vadd.f32 %v2813_v53, %v1390_v38 }
 0x21e   : > { %v1429_v9 = vmax.f32 %v1391_v43, 0.0 }
 0x223   : > { %v1393_v41 = vpop.f32.mrf.mxu2 }
 0x224   : > { %v1394_v20 = vadd.f32 %v2813_v53, %v1393_v41 }
 0x226   : > { %v1430_v36 = vmax.f32 %v1394_v20, 0.0 }
 0x22b   : > { %v1396_v14 = vpop.f32.mrf.mxu2 }
 0x22c   : > { %v1397_v49 = vadd.f32 %v2813_v53, %v1396_v14 }
 0x22e   : > { %v1431_v10 = vmax.f32 %v1397_v49, 0.0 }
 0x233   : > { %v1399_v26 = vpop.f32.mrf.mxu2 }
 0x234   : > { %v1400_v7 = vadd.f32 %v2813_v53, %v1399_v26 }
 0x236   : > { %v1432_v45 = vmax.f32 %v1400_v7, 0.0 }
 0x23b   : > { %v1402_v42 = vpop.f32.mrf.mxu2 }
 0x23c   : > { %v1403_v44 = vadd.f32 %v2813_v53, %v1402_v42  ;;  %v1444_v33 = vpop.permute.xlu0 %1443 }
 0x23d   : > { %v1446_v8 = vperm.slane %v1444_v33, 0 }
 0x23e   : > { %v1433_v57 = vmax.f32 %v1403_v44, 0.0 }
 0x243   : > { %v1405_v47 = vpop.f32.mrf.mxu2 }
 0x244   : > { %v1406_v39 = vadd.f32 %v2813_v53, %v1405_v47 }
 0x246   : > { %v1434_v29 = vmax.f32 %v1406_v39, 0.0 }
 0x24b   : > { %v1408_v40 = vpop.f32.mrf.mxu2 }
 0x24c   : > { %v1409_v34 = vadd.f32 %v2813_v53, %v1408_v40 }
 0x24e   : > { %v1435_v17 = vmax.f32 %v1409_v34, 0.0 }
 0x250   : > { %1699 = vmatpush.xpose.msk.msra.mxu3 %vm1447_vm1, %v1435_v17 }
 0x253   : > { %v1411_v1 = vpop.f32.mrf.mxu2 }
 0x254   : > { %1700 = vmatpush.xpose.msk.msra.mxu3 %vm1447_vm1, %v1434_v29  ;;  %v1412_v55 = vadd.f32 %v2813_v53, %v1411_v1 }
 0x256   : > { %v1436_v18 = vmax.f32 %v1412_v55, 0.0 }
 0x258   : > { %1701 = vmatpush.xpose.msk.msra.mxu3 %vm1447_vm1, %v1433_v57 }
 0x25b   : > { %v1414_v3 = vpop.f32.mrf.mxu2 }
 0x25c   : > { %1702 = vmatpush.xpose.msk.msra.mxu3 %vm1447_vm1, %v1432_v45  ;;  %v1415_v48 = vadd.f32 %v2813_v53, %v1414_v3 }
 0x25e   : > { %v1437_v15 = vmax.f32 %v1415_v48, 0.0 }
 0x260   : > { %1703 = vmatpush.xpose.msk.msra.mxu3 %vm1447_vm1, %v1431_v10 }
 0x263   : > { %v1417_v27 = vpop.f32.mrf.mxu2 }
 0x264   : > { %1704 = vmatpush.xpose.msk.msra.mxu3 %vm1447_vm1, %v1430_v36  ;;  %v1418_v13 = vadd.f32 %v2813_v53, %v1417_v27 }
 0x266   : > { %v1438_v0 = vmax.f32 %v1418_v13, 0.0 }
 0x268   : > { %1705 = vmatpush.xpose.msk.msra.mxu3 %vm1447_vm1, %v1429_v9 }
 0x26c   : > { %1706 = vmatpush.xpose.msk.msra.mxu3 %vm1447_vm1, %v1428_v56 }
 0x270   : > { %1707 = vmatpush.xpose.msk.msra.mxu3 %vm1447_vm1, %v1427_v61 }
 0x274   : > { %1708 = vmatpush.xpose.msk.msra.mxu3 %vm1447_vm1, %v1426_v16 }
 0x278   : > { %1709 = vmatpush.xpose.msk.msra.mxu3 %vm1447_vm1, %v1425_v23 }
 0x27c   : > { %1710 = vmatpush.xpose.msk.msra.mxu3 %vm1447_vm1, %v1424_v5 }
 0x280   : > { %1711 = vmatpush.xpose.msk.msra.mxu3 %vm1447_vm1, %v1423_v52 }
 0x284   : > { %1712 = vmatpush.xpose.msk.msra.mxu3 %vm1447_vm1, %v1422_v62 }
 0x288   : > { %1713 = vmatpush.xpose.msk.msra.mxu3 %vm1447_vm1, %v1421_v46 }
 0x28c   : > { %1714 = vmatpush.xpose.msk.msra.mxu3 %vm1447_vm1, %v1420_v54 }
 0x28f   : > { %1715 = vmatmul.msk.f32.vlgmr.msra.gmra.mxu3 %vm1447_vm1, %v1439_v11 }
 0x290   : > { %1716 = vmatpush.xpose.msk.msrb.mxu3 %vm1447_vm1, %v1438_v0 }
 0x294   : > { %1717 = vmatpush.xpose.msk.msrb.mxu3 %vm1447_vm1, %v1437_v15 }
 0x298   : > { %1718 = vmatpush.xpose.msk.msrb.mxu3 %vm1447_vm1, %v1436_v18 }
 0x29b   : > { %1719 = vmatmul.msk.f32.vlgmr.msrb.gmra.mxu3 %vm1447_vm1, %v1439_v11 }
 0x312   : > { %v1525_v19 = vpop.f32.mrf.mxu3 }
 0x313   : > { %v1526_v24 = vadd.f32 %v1525_v19, %v1446_v8 }
 0x31e   : > { %v1545_v28 = vpop.f32.mrf.mxu3 }
 0x31f   : > { %v1546_v21 = vadd.f32 %v1545_v28, %v1446_v8 }
 0x321   : > { %v1550_v25 = vrot.slane %v1546_v21, 7 }
 0x323   : > { %v1552_v30 = vsel %vm1551_vm2, %v1526_v24, %v1550_v25 }
 0x324   : > { %1558 = vst.msk [vmem:[%s499_s26] sm:$0x3] %vm1556_vm3, %v1552_v30 }
 0x325   : > { %1890 = shalt.err (!%p1887_p8)
}
 0x326   : > { %1781 = dma.vmem_to_hbm [thread:$0]  (%p2053_p11), %s1573_s22, 32, %s1575_s23, %s1560_s12  }
 0x327 PF: > { %s2929_s24 = sld [smem:[#allocation9_spill]]  ;;  %p1788_p10 = pnand %p1671_p9, %p2057_p12 }
 0x329   : > { %p1789_p0 = pneg %p1788_p10 }
 0x32d   : > { %s1586_s17 = sand.u32 1, %s2929_s24  }
 0x32e   : > { %s1587_s25 = scalar_lea.sflag [#allocation5], %s1586_s17 }
 0x32f   : > { %1912 = dma.done.wait (%p1789_p0), %s1587_s25, 32  }
 0x330   : > { %1914 = vsyncadd (%p1789_p0), %s1587_s25, 4294967264  ;;  %s2931_s30 = sld [smem:[#allocation11_spill]]  ;;  %s2934_s27 = smov %s1921_s28 }
 0x331   : > { %s2932_s26 = sld [smem:[#allocation10_spill]] }
 0x332   : > { %s2933_s29 = sld [smem:[#allocation12_spill]] }
 0x336   : > { %p28_p1 = scmp.ge.s32.totalorder %s2931_s30, 4  }
 0x337   : > { %s2935_s28 = smov %s2932_s26 }
 0x338   :  { %30 = sbr.rel (!%p28_p1) target bundleno = 8 (0x8), region = 123 }
 0x33d   :  { %1593 = vsyncpa [#allocation4], 1 }
 0x33e   :  { %1595 = vsyncpa [#allocation4 + $0x1], 1 }
 0x33f   :  { %1596 = vsyncpa [#allocation5], 1 }
 0x340   :  { %1598 = vsyncpa [#allocation5 + $0x1], 1 }

</bundles_post_ra>
